<compile_context>
chip_gen: v7x
topology: tpu7x:2x2x1
jax: 0.10.0
libtpu: 0.0.40
codegen_flags: <defaults>
</compile_context>

<pallas_src>
import functools

import jax
import jax.numpy as jnp
from jax import lax
from jax.experimental import pallas as pl
from jax.experimental.pallas import tpu as pltpu


def _round_up(x, m):
    return ((x + m - 1) // m) * m


def _discriminator_kernel(x_ref,
                          w1, b1, w23, b23, w4, b4, w5, b5,
                          w6t, b6c, w7c, b7,
                          o_ref):
    """Whole MLP chain for one batch tile, entirely in VMEM."""
    bf16 = jnp.bfloat16
    h = x_ref[...].astype(bf16)                                      # (bt, emb)

    # Linear(emb, 2*emb) -> Dropout (eval: identity) -> Tanh
    h = jnp.tanh(jnp.dot(h, w1[...], preferred_element_type=jnp.float32)
                 + b1[...]).astype(bf16)
    # Linear(2*emb, 512) ; Linear(512, 512) folded offline (no nonlinearity
    # between them) -> Dropout (eval: identity) -> Tanh
    h = jnp.tanh(jnp.dot(h, w23[...], preferred_element_type=jnp.float32)
                 + b23[...]).astype(bf16)
    # Linear(512, 256) -> Dropout -> Tanh
    h = jnp.tanh(jnp.dot(h, w4[...], preferred_element_type=jnp.float32)
                 + b4[...]).astype(bf16)
    # Linear(256, 128) -> Dropout -> Tanh
    h5 = jnp.tanh(jnp.dot(h, w5[...], preferred_element_type=jnp.float32)
                  + b5[...]).astype(bf16)                            # (bt, 128)

    # Linear(128, 32) -> Tanh, computed as an NT matmul (contract the lane dim
    # of both operands) so the result is already lane-dense (32, bt); no XLU
    # transpose of the (bt, 128) activation is materialized.
    h6_t = jnp.tanh(
        lax.dot_general(w6t[...], h5,
                        dimension_numbers=(((1,), (1,)), ((), ())),
                        preferred_element_type=jnp.float32)
        + b6c[...])                                                  # (32, bt) f32

    # Linear(32, 1) -> Sigmoid.  N=1 on the MXU would waste >=99% of its
    # columns; do it as a VPU multiply + cross-sublane reduce instead.
    logits = jnp.sum(h6_t * w7c[...], axis=0, keepdims=True) + b7[...]  # (1, bt)
    o_ref[...] = jax.nn.sigmoid(logits).astype(o_ref.dtype)


def init_params(key, emb_features):
    """nn.Linear-style init: U(-1/sqrt(fan_in), +1/sqrt(fan_in)). Returns (w, b) pairs."""
    dims = [emb_features, 2 * emb_features, 512, 512, 256, 128, 32, 1]
    params = []
    for i in range(len(dims) - 1):
        fan_in, fan_out = dims[i], dims[i + 1]
        key, kw, kb = jax.random.split(key, 3)
        bound = 1.0 / jnp.sqrt(jnp.float32(fan_in))
        w = jax.random.uniform(kw, (fan_in, fan_out), jnp.float32, -bound, bound)
        b = jax.random.uniform(kb, (fan_out,), jnp.float32, -bound, bound)
        params.append((w, b))
    return params


def prepare_params(params):
    """Pack params into the layouts/dtypes the kernel expects.

    Folds the activation-free Linear(2*emb,512) into Linear(512,512):
    W23 = W2 @ W3, b23 = b2 @ W3 + b3, computed in f32 and cast to bf16 once.
    Exact algebra in eval mode (dropout = identity).
    """
    (w1, b1), (w2, b2), (w3, b3), (w4, b4), (w5, b5), (w6, b6), (w7, b7) = params
    bf16, f32 = jnp.bfloat16, jnp.float32
    w23 = w2.astype(f32) @ w3.astype(f32)                     # (2*emb, 512) f32
    b23 = b2.astype(f32) @ w3.astype(f32) + b3.astype(f32)    # (512,) f32
    return (
        w1.astype(bf16), b1.reshape(1, -1).astype(f32),
        w23.astype(bf16), b23.reshape(1, -1).astype(f32),
        w4.astype(bf16), b4.reshape(1, -1).astype(f32),
        w5.astype(bf16), b5.reshape(1, -1).astype(f32),
        w6.T.astype(bf16), b6.reshape(-1, 1).astype(f32),     # (32,128), (32,1)
        w7.reshape(-1, 1).astype(f32), b7.reshape(1, 1).astype(f32),
    )


@functools.partial(jax.jit, static_argnums=(2,))
def _forward_impl(x, kernel_params, batch_tile):
    B, emb = x.shape
    num_tiles = pl.cdiv(B, batch_tile)
    B_pad = num_tiles * batch_tile

    # Pad only ragged batches; padded rows are computed and discarded.
    # x stays in its original dtype; the bf16 cast happens inside the kernel.
    x_p = x if B_pad == B else jnp.pad(x, ((0, B_pad - B), (0, 0)))

    # x / output tiled over the batch; every weight/bias is a full (untiled)
    # block with a constant block index, so it stays resident in VMEM across
    # grid iterations (no re-DMA).
    x_spec = pl.BlockSpec((batch_tile, emb), lambda i: (i, 0))
    param_specs = [pl.BlockSpec(p.shape, lambda i: (0, 0)) for p in kernel_params]
    out_spec = pl.BlockSpec((1, batch_tile), lambda i: (0, i))   # lane-dense output

    # Cost model after the 512x512 fold.
    dims = [emb, 2 * emb, 512, 256, 128, 32, 1]
    flops = 2 * B_pad * sum(a * b for a, b in zip(dims[:-1], dims[1:]))
    transcendentals = B_pad * (2 * emb + 512 + 256 + 128 + 32 + 1)
    param_bytes = sum(int(p.size) * p.dtype.itemsize for p in kernel_params)
    bytes_accessed = int(x_p.size) * x_p.dtype.itemsize + param_bytes + B_pad * 4

    out = pl.pallas_call(
        _discriminator_kernel,
        out_shape=jax.ShapeDtypeStruct((1, B_pad), jnp.float32),
        grid_spec=pltpu.PrefetchScalarGridSpec(
            num_scalar_prefetch=0,
            grid=(num_tiles,),
            in_specs=[x_spec] + param_specs,
            out_specs=out_spec,
        ),
        compiler_params=pltpu.CompilerParams(
            dimension_semantics=("parallel",),
        ),
        cost_estimate=pl.CostEstimate(
            flops=flops,
            transcendentals=transcendentals,
            bytes_accessed=bytes_accessed,
        ),
    )(x_p, *kernel_params)

    # PyTorch: .squeeze() on (B, 1) -> (B,)
    return out.reshape(-1)[:B]


def _choose_batch_tile(B):
    # Tiny batches: one minimal sublane/MXU-aligned tile (avoid huge padding).
    if B <= 256:
        return max(128, _round_up(B, 128))
    # Large batches: 256..1024-row tiles to amortize ~0.35us/grid-step, split
    # into >=2 tiles so the "parallel" grid axis shards across both v7x cores.
    return min(1024, max(256, _round_up(pl.cdiv(B, 2), 256)))


def discriminator_forward(x, kernel_params, batch_tile=None):
    if batch_tile is None:
        batch_tile = _choose_batch_tile(x.shape[0])
    return _forward_impl(x, kernel_params, int(batch_tile))


def reference_forward(x, params):
    """Pure-JAX f32 reference (eval-mode dropout = identity), unfused."""
    (w1, b1), (w2, b2), (w3, b3), (w4, b4), (w5, b5), (w6, b6), (w7, b7) = params
    h = jnp.tanh(x @ w1 + b1)
    h = h @ w2 + b2
    h = jnp.tanh(h @ w3 + b3)
    h = jnp.tanh(h @ w4 + b4)
    h = jnp.tanh(h @ w5 + b5)
    h = jnp.tanh(h @ w6 + b6)
    return jax.nn.sigmoid(h @ w7 + b7)[:, 0]


if __name__ == "__main__":
    emb_features = 32
    batch = 64

    key = jax.random.PRNGKey(0)
    key, kx = jax.random.split(key)
    x = jax.random.normal(kx, (batch, emb_features), dtype=jnp.float32)

    params = init_params(key, emb_features)
    kernel_params = prepare_params(params)

    y = discriminator_forward(x, kernel_params)
    jax.block_until_ready(y)

    assert y.shape == (batch,)
    assert bool(jnp.all(jnp.isfinite(y)))
    assert bool(jnp.all((y >= 0.0) & (y <= 1.0)))

    y_ref = reference_forward(x, params)
    max_err = float(jnp.max(jnp.abs(y - y_ref)))
    assert max_err < 5e-2, f"mismatch vs f32 reference: {max_err}"

    print("KERNEL_OK")
</pallas_src>

<mosaic_0001>
module attributes {stable_mosaic.version = 11 : i64} {
  func.func @_discriminator_kernel(%arg0: i32, %arg1: memref<128x32xf32, #tpu.memory_space<vmem>>, %arg2: memref<32x64xbf16, #tpu.memory_space<vmem>>, %arg3: memref<1x64xf32, #tpu.memory_space<vmem>>, %arg4: memref<64x512xbf16, #tpu.memory_space<vmem>>, %arg5: memref<1x512xf32, #tpu.memory_space<vmem>>, %arg6: memref<512x256xbf16, #tpu.memory_space<vmem>>, %arg7: memref<1x256xf32, #tpu.memory_space<vmem>>, %arg8: memref<256x128xbf16, #tpu.memory_space<vmem>>, %arg9: memref<1x128xf32, #tpu.memory_space<vmem>>, %arg10: memref<32x128xbf16, #tpu.memory_space<vmem>>, %arg11: memref<32x1xf32, #tpu.memory_space<vmem>>, %arg12: memref<32x1xf32, #tpu.memory_space<vmem>>, %arg13: memref<1x1xf32, #tpu.memory_space<vmem>>, %arg14: memref<1x128xf32, #tpu.memory_space<vmem>>) attributes {dimension_semantics = [#tpu.dimension_semantics<parallel>], iteration_bounds = array<i64: 1>, scalar_prefetch = 0 : i64, scratch_operands = 0 : i64, tpu.core_type = #tpu.core_type<tc>, window_params = [{transform_indices = @transform_0, window_bounds = array<i64: 128, 32>}, {pipeline_mode = #tpu.pipeline_mode<synchronous>, transform_indices = @transform_1, window_bounds = array<i64: 32, 64>}, {pipeline_mode = #tpu.pipeline_mode<synchronous>, transform_indices = @transform_2, window_bounds = array<i64: 1, 64>}, {pipeline_mode = #tpu.pipeline_mode<synchronous>, transform_indices = @transform_3, window_bounds = array<i64: 64, 512>}, {pipeline_mode = #tpu.pipeline_mode<synchronous>, transform_indices = @transform_4, window_bounds = array<i64: 1, 512>}, {pipeline_mode = #tpu.pipeline_mode<synchronous>, transform_indices = @transform_5, window_bounds = array<i64: 512, 256>}, {pipeline_mode = #tpu.pipeline_mode<synchronous>, transform_indices = @transform_6, window_bounds = array<i64: 1, 256>}, {pipeline_mode = #tpu.pipeline_mode<synchronous>, transform_indices = @transform_7, window_bounds = array<i64: 256, 128>}, {pipeline_mode = #tpu.pipeline_mode<synchronous>, transform_indices = @transform_8, window_bounds = array<i64: 1, 128>}, {pipeline_mode = #tpu.pipeline_mode<synchronous>, transform_indices = @transform_9, window_bounds = array<i64: 32, 128>}, {pipeline_mode = #tpu.pipeline_mode<synchronous>, transform_indices = @transform_10, window_bounds = array<i64: 32, 1>}, {pipeline_mode = #tpu.pipeline_mode<synchronous>, transform_indices = @transform_11, window_bounds = array<i64: 32, 1>}, {pipeline_mode = #tpu.pipeline_mode<synchronous>, transform_indices = @transform_12, window_bounds = array<i64: 1, 1>}, {transform_indices = @transform_13, window_bounds = array<i64: 1, 128>}]} {
    %c0 = arith.constant 0 : index
    %c0_0 = arith.constant 0 : index
    %0 = vector.load %arg1[%c0, %c0_0] : memref<128x32xf32, #tpu.memory_space<vmem>>, vector<128x32xf32>
    %1 = arith.truncf %0 : vector<128x32xf32> to vector<128x32xbf16>
    %c0_1 = arith.constant 0 : index
    %c0_2 = arith.constant 0 : index
    %2 = vector.load %arg2[%c0_1, %c0_2] : memref<32x64xbf16, #tpu.memory_space<vmem>>, vector<32x64xbf16>
    %cst = arith.constant dense<0.000000e+00> : vector<128x64xf32>
    %3 = tpu.matmul %1, %2, %cst {dimension_numbers = #tpu.dot_dimension_numbers<[1], [0], [0], [1], [0, 0, 1, 1], [], []>} : vector<128x32xbf16>, vector<32x64xbf16>, vector<128x64xf32> -> vector<128x64xf32>
    %c0_3 = arith.constant 0 : index
    %c0_4 = arith.constant 0 : index
    %4 = vector.load %arg3[%c0_3, %c0_4] : memref<1x64xf32, #tpu.memory_space<vmem>>, vector<1x64xf32>
    %5 = vector.broadcast %4 : vector<1x64xf32> to vector<128x64xf32>
    %6 = arith.addf %3, %5 : vector<128x64xf32>
    %7 = math.tanh %6 : vector<128x64xf32>
    %8 = arith.truncf %7 : vector<128x64xf32> to vector<128x64xbf16>
    %c0_5 = arith.constant 0 : index
    %c0_6 = arith.constant 0 : index
    %9 = vector.load %arg4[%c0_5, %c0_6] : memref<64x512xbf16, #tpu.memory_space<vmem>>, vector<64x512xbf16>
    %cst_7 = arith.constant dense<0.000000e+00> : vector<128x512xf32>
    %10 = tpu.matmul %8, %9, %cst_7 {dimension_numbers = #tpu.dot_dimension_numbers<[1], [0], [0], [1], [0, 0, 1, 1], [], []>} : vector<128x64xbf16>, vector<64x512xbf16>, vector<128x512xf32> -> vector<128x512xf32>
    %c0_8 = arith.constant 0 : index
    %c0_9 = arith.constant 0 : index
    %11 = vector.load %arg5[%c0_8, %c0_9] : memref<1x512xf32, #tpu.memory_space<vmem>>, vector<1x512xf32>
    %12 = vector.broadcast %11 : vector<1x512xf32> to vector<128x512xf32>
    %13 = arith.addf %10, %12 : vector<128x512xf32>
    %14 = math.tanh %13 : vector<128x512xf32>
    %15 = arith.truncf %14 : vector<128x512xf32> to vector<128x512xbf16>
    %c0_10 = arith.constant 0 : index
    %c0_11 = arith.constant 0 : index
    %16 = vector.load %arg6[%c0_10, %c0_11] : memref<512x256xbf16, #tpu.memory_space<vmem>>, vector<512x256xbf16>
    %cst_12 = arith.constant dense<0.000000e+00> : vector<128x256xf32>
    %17 = tpu.matmul %15, %16, %cst_12 {dimension_numbers = #tpu.dot_dimension_numbers<[1], [0], [0], [1], [0, 0, 1, 1], [], []>} : vector<128x512xbf16>, vector<512x256xbf16>, vector<128x256xf32> -> vector<128x256xf32>
    %c0_13 = arith.constant 0 : index
    %c0_14 = arith.constant 0 : index
    %18 = vector.load %arg7[%c0_13, %c0_14] : memref<1x256xf32, #tpu.memory_space<vmem>>, vector<1x256xf32>
    %19 = vector.broadcast %18 : vector<1x256xf32> to vector<128x256xf32>
    %20 = arith.addf %17, %19 : vector<128x256xf32>
    %21 = math.tanh %20 : vector<128x256xf32>
    %22 = arith.truncf %21 : vector<128x256xf32> to vector<128x256xbf16>
    %c0_15 = arith.constant 0 : index
    %c0_16 = arith.constant 0 : index
    %23 = vector.load %arg8[%c0_15, %c0_16] : memref<256x128xbf16, #tpu.memory_space<vmem>>, vector<256x128xbf16>
    %cst_17 = arith.constant dense<0.000000e+00> : vector<128x128xf32>
    %24 = tpu.matmul %22, %23, %cst_17 {dimension_numbers = #tpu.dot_dimension_numbers<[1], [0], [0], [1], [0, 0, 1, 1], [], []>} : vector<128x256xbf16>, vector<256x128xbf16>, vector<128x128xf32> -> vector<128x128xf32>
    %c0_18 = arith.constant 0 : index
    %c0_19 = arith.constant 0 : index
    %25 = vector.load %arg9[%c0_18, %c0_19] : memref<1x128xf32, #tpu.memory_space<vmem>>, vector<1x128xf32>
    %26 = vector.broadcast %25 : vector<1x128xf32> to vector<128x128xf32>
    %27 = arith.addf %24, %26 : vector<128x128xf32>
    %28 = math.tanh %27 : vector<128x128xf32>
    %29 = arith.truncf %28 : vector<128x128xf32> to vector<128x128xbf16>
    %c0_20 = arith.constant 0 : index
    %c0_21 = arith.constant 0 : index
    %30 = vector.load %arg10[%c0_20, %c0_21] : memref<32x128xbf16, #tpu.memory_space<vmem>>, vector<32x128xbf16>
    %cst_22 = arith.constant dense<0.000000e+00> : vector<32x128xf32>
    %31 = tpu.matmul %30, %29, %cst_22 {dimension_numbers = #tpu.dot_dimension_numbers<[1], [1], [0], [0], [0, 0, 1, 0], [], []>} : vector<32x128xbf16>, vector<128x128xbf16>, vector<32x128xf32> -> vector<32x128xf32>
    %c0_23 = arith.constant 0 : index
    %c0_24 = arith.constant 0 : index
    %32 = vector.load %arg11[%c0_23, %c0_24] : memref<32x1xf32, #tpu.memory_space<vmem>>, vector<32x1xf32>
    %33 = vector.broadcast %32 : vector<32x1xf32> to vector<32x128xf32>
    %34 = arith.addf %31, %33 : vector<32x128xf32>
    %35 = math.tanh %34 : vector<32x128xf32>
    %c0_25 = arith.constant 0 : index
    %c0_26 = arith.constant 0 : index
    %36 = vector.load %arg12[%c0_25, %c0_26] : memref<32x1xf32, #tpu.memory_space<vmem>>, vector<32x1xf32>
    %37 = vector.broadcast %36 : vector<32x1xf32> to vector<32x128xf32>
    %38 = arith.mulf %35, %37 : vector<32x128xf32>
    %cst_27 = arith.constant dense<0.000000e+00> : vector<128xf32>
    %39 = vector.multi_reduction <add>, %38, %cst_27 [0] : vector<32x128xf32> to vector<128xf32>
    %40 = vector.shape_cast %39 : vector<128xf32> to vector<1x128xf32>
    %c0_28 = arith.constant 0 : index
    %c0_29 = arith.constant 0 : index
    %41 = vector.load %arg13[%c0_28, %c0_29] : memref<1x1xf32, #tpu.memory_space<vmem>>, vector<1x1xf32>
    %42 = vector.broadcast %41 : vector<1x1xf32> to vector<1x128xf32>
    %43 = arith.addf %40, %42 : vector<1x128xf32>
    %44 = arith.negf %43 : vector<1x128xf32>
    %45 = math.exp %44 : vector<1x128xf32>
    %cst_30 = arith.constant 1.000000e+00 : f32
    %46 = vector.broadcast %cst_30 : f32 to vector<1x128xf32>
    %47 = arith.addf %46, %45 : vector<1x128xf32>
    %48 = arith.divf %46, %47 : vector<1x128xf32>
    %c0_31 = arith.constant 0 : index
    %c0_32 = arith.constant 0 : index
    %49 = vector.load %arg14[%c0_31, %c0_32] : memref<1x128xf32, #tpu.memory_space<vmem>>, vector<1x128xf32>
    tpu.vector_store %arg14[%c0_31, %c0_32], %48 {strides = array<i32>} : memref<1x128xf32, #tpu.memory_space<vmem>>, vector<1x128xf32>,
    return
  }
  func.func @transform_0(%arg0: i32) -> (i32, i32) {
    %c0_i32 = arith.constant 0 : i32
    %c0_i32_0 = arith.constant 0 : i32
    return %arg0, %c0_i32 : i32, i32
  }
  func.func @transform_1(%arg0: i32) -> (i32, i32) {
    %c0_i32 = arith.constant 0 : i32
    %c0_i32_0 = arith.constant 0 : i32
    %c0_i32_1 = arith.constant 0 : i32
    return %c0_i32, %c0_i32_0 : i32, i32
  }
  func.func @transform_2(%arg0: i32) -> (i32, i32) {
    %c0_i32 = arith.constant 0 : i32
    %c0_i32_0 = arith.constant 0 : i32
    %c0_i32_1 = arith.constant 0 : i32
    return %c0_i32, %c0_i32_0 : i32, i32
  }
  func.func @transform_3(%arg0: i32) -> (i32, i32) {
    %c0_i32 = arith.constant 0 : i32
    %c0_i32_0 = arith.constant 0 : i32
    %c0_i32_1 = arith.constant 0 : i32
    return %c0_i32, %c0_i32_0 : i32, i32
  }
  func.func @transform_4(%arg0: i32) -> (i32, i32) {
    %c0_i32 = arith.constant 0 : i32
    %c0_i32_0 = arith.constant 0 : i32
    %c0_i32_1 = arith.constant 0 : i32
    return %c0_i32, %c0_i32_0 : i32, i32
  }
  func.func @transform_5(%arg0: i32) -> (i32, i32) {
    %c0_i32 = arith.constant 0 : i32
    %c0_i32_0 = arith.constant 0 : i32
    %c0_i32_1 = arith.constant 0 : i32
    return %c0_i32, %c0_i32_0 : i32, i32
  }
  func.func @transform_6(%arg0: i32) -> (i32, i32) {
    %c0_i32 = arith.constant 0 : i32
    %c0_i32_0 = arith.constant 0 : i32
    %c0_i32_1 = arith.constant 0 : i32
    return %c0_i32, %c0_i32_0 : i32, i32
  }
  func.func @transform_7(%arg0: i32) -> (i32, i32) {
    %c0_i32 = arith.constant 0 : i32
    %c0_i32_0 = arith.constant 0 : i32
    %c0_i32_1 = arith.constant 0 : i32
    return %c0_i32, %c0_i32_0 : i32, i32
  }
  func.func @transform_8(%arg0: i32) -> (i32, i32) {
    %c0_i32 = arith.constant 0 : i32
    %c0_i32_0 = arith.constant 0 : i32
    %c0_i32_1 = arith.constant 0 : i32
    return %c0_i32, %c0_i32_0 : i32, i32
  }
  func.func @transform_9(%arg0: i32) -> (i32, i32) {
    %c0_i32 = arith.constant 0 : i32
    %c0_i32_0 = arith.constant 0 : i32
    %c0_i32_1 = arith.constant 0 : i32
    return %c0_i32, %c0_i32_0 : i32, i32
  }
  func.func @transform_10(%arg0: i32) -> (i32, i32) {
    %c0_i32 = arith.constant 0 : i32
    %c0_i32_0 = arith.constant 0 : i32
    %c0_i32_1 = arith.constant 0 : i32
    return %c0_i32, %c0_i32_0 : i32, i32
  }
  func.func @transform_11(%arg0: i32) -> (i32, i32) {
    %c0_i32 = arith.constant 0 : i32
    %c0_i32_0 = arith.constant 0 : i32
    %c0_i32_1 = arith.constant 0 : i32
    return %c0_i32, %c0_i32_0 : i32, i32
  }
  func.func @transform_12(%arg0: i32) -> (i32, i32) {
    %c0_i32 = arith.constant 0 : i32
    %c0_i32_0 = arith.constant 0 : i32
    %c0_i32_1 = arith.constant 0 : i32
    return %c0_i32, %c0_i32_0 : i32, i32
  }
  func.func @transform_13(%arg0: i32) -> (i32, i32) {
    %c0_i32 = arith.constant 0 : i32
    %c0_i32_0 = arith.constant 0 : i32
    return %c0_i32, %arg0 : i32, i32
  }
}

</mosaic_0001>

<bundles_post_ra>
// kernel: _forward_impl.1
= control target key start
LH: loop header
LB: loop body
LE: loop exit
PB: predicated region body
PF: predicated region fallthrough
CT: control target
= control target key end

     0   :  { %s3153_s0 = inlined_call_operand.vmem [shape: f32[128,32], index: 0, kind: input, shape index: {}]   ;;  %s3154_s1 = inlined_call_operand.vmem [shape: bf16[32,64], index: 1, kind: input, shape index: {}]   ;;  %s3155_s2 = inlined_call_operand.vmem [shape: f32[1,64], index: 2, kind: input, shape index: {}]   ;;  %s3156_s3 = inlined_call_operand.vmem [shape: bf16[64,512], index: 3, kind: input, shape index: {}]   ;;  %s3157_s4 = inlined_call_operand.vmem [shape: f32[1,512], index: 4, kind: input, shape index: {}]   ;;  %s3158_s5 = inlined_call_operand.hbm [shape: bf16[512,256], index: 5, kind: input, shape index: {}]   ;;  %s3159_s6 = inlined_call_operand.vmem [shape: f32[1,256], index: 6, kind: input, shape index: {}]   ;;  %s3160_s7 = inlined_call_operand.vmem [shape: bf16[256,128], index: 7, kind: input, shape index: {}]   ;;  %s3161_s8 = inlined_call_operand.vmem [shape: f32[1,128], index: 8, kind: input, shape index: {}]   ;;  %s3162_s9 = inlined_call_operand.vmem [shape: bf16[32,128], index: 9, kind: input, shape index: {}]   ;;  %s3163_s10 = inlined_call_operand.vmem [shape: f32[32,1], index: 10, kind: input, shape index: {}]   ;;  %s3164_s11 = inlined_call_operand.vmem [shape: f32[32,1], index: 11, kind: input, shape index: {}]   ;;  %s3165_s12 = inlined_call_operand.<no memory space> [shape: f32[1,1], index: 12, kind: input, shape index: {}]   ;;  %s3166_s13 = inlined_call_operand.vmem [shape: f32[1,128], index: 13, kind: output, shape index: {}]  }
   0x1   :  { %v18_v0 = vstv %s3165_s12 }
   0x2   :  { %19 = vst [vmem:[#allocation2] sm:$0x1] %v18_v0 }
   0x3   :  { %20 = vsyncpa [#allocation4], 0  ;;  %s2551_s27 = smov [#allocation3]   ;;  %s2527_s14 = scalar_lea.hbm %s3158_s5, 8192 }
   0x4   :  { %s36_s28 = sshll.u32 %s2551_s27, 4  ;;  %p2528_p0 = scmp.ne.s32.totalorder %s3158_s5, %s2527_s14  ;;  %s37_s28 = int_to_ptr.vmem [resolvable:$true] %s36_s28 }
   0x5   :  { %p2531_p1 = scmp.lt.u32.totalorder %s2527_s14, %s3158_s5 }
   0x7   :  { %p2533_p2 = pnand %p2531_p1, %p2528_p0 }
   0x9   :  { %2536 = shalt.err (!%p2533_p2)
}
   0xa   :  { %s2537_s12 = scalar_lea.vmem %s37_s28, 8192  ;;  %p2542_p4 = scmp.lt.s32.totalorder %s37_s28, %s37_s28 }
   0xb   :  { %p2538_p3 = scmp.ne.s32.totalorder %s37_s28, %s2537_s12  ;;  %p2543_p5 = scmp.lt.s32.totalorder %s2537_s12, %s2537_s12 }
   0xd   :  { %p2544_p6 = por %p2543_p5, %p2542_p4 }
   0xf   :  { %p2545_p7 = pnand %p2544_p6, %p2538_p3 }
  0x11   :  { %2548 = shalt.err (!%p2545_p7)
}
  0x12   :  { %s2552_s19 = smov 128   ;;  %s2553_s20 = smov 8  }
  0x13   :  { %42 = dma.hbm_to_vmem [thread:$0]  %s3158_s5, 8192, %s37_s28, [#allocation4], %s2552_s19, %s2552_s19, %s2553_s20  }
  0x14   :  { %2549 = dma.done.wait [#allocation4], 8192  }
  0x15   :  { %2550 = vsyncadd [#allocation4], 4294959104  ;;  %v2119_v1 = vld [vmem:[%s3154_s1] sm:$0xff]   ;;  %v2120_v2 = vld [vmem:[%s3154_s1 + $0x8] sm:$0xff]   ;;  %vm108_vm0 = vcmask 261120   ;;  %v2554_v43 = vmov 0  }
  0x16   :  { %2009 = vmatprep.subr.bf16.mxu0 %v2119_v1  ;;  %v61_v3 = vld [vmem:[%s3153_s0] sm:$0xff]  ;;  %v62_v4 = vld [vmem:[%s3153_s0 + $0x8] sm:$0xff]  ;;  %v63_v6 = vld [vmem:[%s3153_s0 + $0x10] sm:$0xff]  ;;  %429 = vmatprep.mubr.bf16.mxu1 %v2554_v43  ;;  %vm372_vm1 = vcmask 523264  }
  0x17   :  { %2010 = vmatpush3.bf16.msra.mxu0 %v2119_v1  ;;  %v77_v5 = vpack.c.bf16 %v62_v4, %v61_v3  ;;  %v64_v7 = vld [vmem:[%s3153_s0 + $0x18] sm:$0xff]  ;;  %v65_v8 = vld [vmem:[%s3153_s0 + $0x20] sm:$0xff]  ;;  %v66_v9 = vld [vmem:[%s3153_s0 + $0x28] sm:$0xff]  ;;  %2117 = vset.pattern.permute.xlu0 %v2554_v43 }
  0x18   :  { %2011 = vmatprep.subr.bf16.mxu0 %v2120_v2  ;;  %v78_v10 = vpack.c.bf16 %v64_v7, %v63_v6  ;;  %v79_v11 = vpack.c.bf16 %v66_v9, %v65_v8  ;;  %v67_v12 = vld [vmem:[%s3153_s0 + $0x30] sm:$0xff]  ;;  %v68_v13 = vld [vmem:[%s3153_s0 + $0x38] sm:$0xff]  ;;  %v69_v14 = vld [vmem:[%s3153_s0 + $0x40] sm:$0xff]  ;;  %2118 = vset.pattern.permute.xlu1 %v2554_v43 }
  0x19   :  { %2013 = vmatprep.mubr.msk.bf16.mxu0 %vm108_vm0, %v77_v5  ;;  %v70_v15 = vld [vmem:[%s3153_s0 + $0x48] sm:$0xff]  ;;  %v80_v16 = vpack.c.bf16 %v68_v13, %v67_v12  ;;  %v71_v18 = vld [vmem:[%s3153_s0 + $0x50] sm:$0xff]  ;;  %v72_v19 = vld [vmem:[%s3153_s0 + $0x58] sm:$0xff] }
  0x1a   :  { %v81_v17 = vpack.c.bf16 %v70_v15, %v69_v14  ;;  %v73_v20 = vld [vmem:[%s3153_s0 + $0x60] sm:$0xff]  ;;  %v74_v21 = vld [vmem:[%s3153_s0 + $0x68] sm:$0xff]  ;;  %v82_v22 = vpack.c.bf16 %v72_v19, %v71_v18  ;;  %v75_v24 = vld [vmem:[%s3153_s0 + $0x70] sm:$0xff] }
  0x1b   :  { %2012 = vmatpush3.bf16.msra.mxu0 %v2120_v2  ;;  %v83_v23 = vpack.c.bf16 %v74_v21, %v73_v20  ;;  %v76_v25 = vld [vmem:[%s3153_s0 + $0x78] sm:$0xff]  ;;  %v2121_v27 = vld [vmem:[%s3156_s3 + $0x4] ss:$16 sps:$4 sm:$0xff]   ;;  %v2126_v30 = vld [vmem:[%s3156_s3] ss:$16 sps:$4 sm:$0xff]  }
  0x1c   :  { %v84_v26 = vpack.c.bf16 %v76_v25, %v75_v24  ;;  %v2125_v28 = vld [vmem:[%s3156_s3 + $0xc] ss:$16 sps:$4 sm:$0xff]   ;;  %v2123_v29 = vld [vmem:[%s3156_s3 + $0x8] ss:$16 sps:$4 sm:$0xff]   ;;  %397 = vmatprep.subr.bf16.mxu1 %v2121_v27  ;;  %v2127_v31 = vld [vmem:[%s3156_s3 + $0x24] ss:$16 sps:$4 sm:$0xff]  }
  0x1d   :  { %510 = vmatprep.subr.bf16.mxu0 %v2125_v28  ;;  %398 = vmatpush1.bf16.msra.mxu1 %v2126_v30  ;;  %v2131_v32 = vld [vmem:[%s3156_s3 + $0x2c] ss:$16 sps:$4 sm:$0xff]   ;;  %v2129_v33 = vld [vmem:[%s3156_s3 + $0x28] ss:$16 sps:$4 sm:$0xff]   ;;  %v2132_v34 = vld [vmem:[%s3156_s3 + $0x20] ss:$16 sps:$4 sm:$0xff]  }
  0x1e   :  { %2014 = vmatmul.mubr.msk.bf16.vlgmr.msra.gmra.mrb[0].mxu0 %vm108_vm0, %v78_v10  ;;  %v2133_v35 = vld [vmem:[%s3156_s3 + $0x44] ss:$16 sps:$4 sm:$0xff]   ;;  %399 = vmatprep.subr.bf16.mxu1 %v2127_v31  ;;  %v2137_v36 = vld [vmem:[%s3156_s3 + $0x4c] ss:$16 sps:$4 sm:$0xff]   ;;  %v2135_v37 = vld [vmem:[%s3156_s3 + $0x48] ss:$16 sps:$4 sm:$0xff]  }
  0x1f   :  { %2017 = vmatprep.mubr.msk.bf16.mxu0 %vm108_vm0, %v79_v11  ;;  %511 = vmatpush1.bf16.msra.mxu0 %v2123_v29  ;;  %v2138_v38 = vld [vmem:[%s3156_s3 + $0x40] ss:$16 sps:$4 sm:$0xff]   ;;  %v2139_v39 = vld [vmem:[%s3156_s3 + $0x64] ss:$16 sps:$4 sm:$0xff]   ;;  %v2141_v40 = vld [vmem:[%s3156_s3 + $0x68] ss:$16 sps:$4 sm:$0xff]  }
  0x20   :  { %512 = vmatprep.subr.bf16.mxu0 %v2131_v32  ;;  %v2143_v41 = vld [vmem:[%s3156_s3 + $0x6c] ss:$16 sps:$4 sm:$0xff]   ;;  %v2144_v42 = vld [vmem:[%s3156_s3 + $0x60] ss:$16 sps:$4 sm:$0xff]  }
  0x21   :  { %400 = vmatpush1.bf16.msra.mxu1 %v2132_v34  ;;  %v2147_v44 = vld [vmem:[#allocation3 + $0x4] ss:$8 sps:$4 sm:$0xff]   ;;  %v2757_v45 = vld [vmem:[%s3155_s2] ss:$0 sm:$0xff]  ;;  %v2145_v7 = vld [vmem:[#allocation3] ss:$8 sps:$4 sm:$0xff]  }
  0x22   :  { %401 = vmatprep.subr.bf16.mxu1 %v2133_v35  ;;  %v2150_v10 = vld [vmem:[#allocation3 + $0x14] ss:$8 sps:$4 sm:$0xff]   ;;  %v2148_v15 = vld [vmem:[#allocation3 + $0x10] ss:$8 sps:$4 sm:$0xff]   ;;  %v2151_v25 = vld [vmem:[#allocation3 + $0x20] ss:$8 sps:$4 sm:$0xff]  }
  0x23   :  { %513 = vmatpush1.bf16.msra.mxu0 %v2129_v33  ;;  %v2156_v28 = vld [vmem:[#allocation3 + $0x34] ss:$8 sps:$4 sm:$0xff]   ;;  %v2154_v33 = vld [vmem:[#allocation3 + $0x30] ss:$8 sps:$4 sm:$0xff]   ;;  %v2159_v35 = vld [vmem:[#allocation3 + $0x44] ss:$8 sps:$4 sm:$0xff]  }
  0x24   :  { %514 = vmatprep.subr.bf16.mxu0 %v2137_v36 }
  0x25   :  { %402 = vmatpush1.bf16.msra.mxu1 %v2138_v38 }
  0x26   :  { %2018 = vmatmul.mubr.msk.bf16.gmra.mrb[4].mxu0 %vm108_vm0, %v80_v16  ;;  %403 = vmatprep.subr.bf16.mxu1 %v2139_v39 }
  0x27   :  { %2021 = vmatprep.mubr.msk.bf16.mxu0 %vm108_vm0, %v81_v17  ;;  %515 = vmatpush1.bf16.msra.mxu0 %v2135_v37  ;;  %v2153_v17 = vld [vmem:[#allocation3 + $0x24] ss:$8 sps:$4 sm:$0xff]  }
  0x28   :  { %516 = vmatprep.subr.bf16.mxu0 %v2143_v41  ;;  %v2162_v41 = vld [vmem:[#allocation3 + $0x54] ss:$8 sps:$4 sm:$0xff]  }
  0x29   :  { %404 = vmatpush1.bf16.msra.mxu1 %v2144_v42 }
  0x2a   :  { %1115 = vmatprep.subr.bf16.mxu1 %v2147_v44  ;;  %v2160_v44 = vld [vmem:[#allocation3 + $0x50] ss:$8 sps:$4 sm:$0xff]  }
  0x2b   :  { %517 = vmatpush1.bf16.msra.mxu0 %v2141_v40  ;;  %v2157_v40 = vld [vmem:[#allocation3 + $0x40] ss:$8 sps:$4 sm:$0xff]  }
  0x2e   :  { %2022 = vmatmul.mubr.msk.bf16.gmra.mrb[8].mxu0 %vm108_vm0, %v82_v22 }
  0x2f   :  { %2025 = vmatprep.mubr.msk.bf16.mxu0 %vm108_vm0, %v83_v23 }
  0x36   :  { %2026 = vmatmul.mubr.msk.bf16.gmra.mrb[12].mxu0 %vm108_vm0, %v84_v26 }
  0x37   :  { %542 = vmatprep.mubr.bf16.mxu0 %v2554_v43 }
  0xf1   :  { %v2015_v46 = vpop.f32.mrb[0].mxu0 }
  0xf2   :  { %v176_v47 = vadd.f32 %v2015_v46, %v2757_v45  ;;  %v167_v48 = vpop.f32.mrb[1].mxu0  ;;  %v2165_v46 = vld [vmem:[#allocation3 + $0x64] ss:$8 sps:$4 sm:$0xff]  }
  0xf3   :  { %v168_v49 = vadd.f32 %v2757_v45, %v167_v48  ;;  %v2016_v50 = vpop.f32.mrb[2].mxu0 }
  0xf4   :  { %2259 = vtanh.f32 %v176_v47  ;;  %v179_v51 = vadd.f32 %v2016_v50, %v2757_v45  ;;  %v170_v52 = vpop.f32.mrb[3].mxu0 }
  0xf5   :  { %2261 = vtanh.f32 %v168_v49  ;;  %v171_v53 = vadd.f32 %v2757_v45, %v170_v52  ;;  %v2168_v52 = vld [vmem:[#allocation3 + $0x74] ss:$8 sps:$4 sm:$0xff]  }
  0xf6   :  { %2263 = vtanh.f32 %v179_v51  ;;  %v2163_v51 = vld [vmem:[#allocation3 + $0x60] ss:$8 sps:$4 sm:$0xff]  }
  0xf7   :  { %2265 = vtanh.f32 %v171_v53  ;;  %v2166_v53 = vld [vmem:[#allocation3 + $0x70] ss:$8 sps:$4 sm:$0xff]  }
  0xf9   :  { %v2019_v54 = vpop.f32.mrb[4].mxu0 }
  0xfa   :  { %v192_v55 = vadd.f32 %v2019_v54, %v2757_v45  ;;  %v183_v56 = vpop.f32.mrb[5].mxu0  ;;  %v2171_v54 = vld [vmem:[#allocation3 + $0x84] ss:$8 sps:$4 sm:$0xff]  }
  0xfb   :  { %v184_v57 = vadd.f32 %v2757_v45, %v183_v56  ;;  %v2020_v58 = vpop.f32.mrb[6].mxu0  ;;  %v2174_v56 = vld [vmem:[#allocation3 + $0x94] ss:$8 sps:$4 sm:$0xff]  }
  0xfc   :  { %2267 = vtanh.f32 %v192_v55  ;;  %v195_v59 = vadd.f32 %v2020_v58, %v2757_v45  ;;  %v186_v60 = vpop.f32.mrb[7].mxu0  ;;  %v2169_v55 = vld [vmem:[#allocation3 + $0x80] ss:$8 sps:$4 sm:$0xff]   ;;  %v2177_v58 = vld [vmem:[#allocation3 + $0xa4] ss:$8 sps:$4 sm:$0xff]  }
  0xfd   :  { %2269 = vtanh.f32 %v184_v57  ;;  %v187_v61 = vadd.f32 %v2757_v45, %v186_v60  ;;  %v2172_v57 = vld [vmem:[#allocation3 + $0x90] ss:$8 sps:$4 sm:$0xff]   ;;  %v2180_v60 = vld [vmem:[#allocation3 + $0xb4] ss:$8 sps:$4 sm:$0xff]  }
  0xfe   :  { %v2260_v62 = vpop.eup %2259  ;;  %2271 = vtanh.f32 %v195_v59  ;;  %v2175_v59 = vld [vmem:[#allocation3 + $0xa0] ss:$8 sps:$4 sm:$0xff]  }
  0xff   :  { %v2262_v63 = vpop.eup %2261  ;;  %2273 = vtanh.f32 %v187_v61  ;;  %v2178_v61 = vld [vmem:[#allocation3 + $0xb0] ss:$8 sps:$4 sm:$0xff]  }
 0x100   :  { %v2264_v0 = vpop.eup %2263 }
 0x101   :  { %v2266_v1 = vpop.eup %2265  ;;  %v247_v2 = vpack.c.bf16 %v2264_v0, %v2260_v62  ;;  %v2023_v3 = vpop.f32.mrb[8].mxu0  ;;  %v2183_v62 = vld [vmem:[#allocation3 + $0xc4] ss:$8 sps:$4 sm:$0xff]   ;;  %v2186_v0 = vld [vmem:[#allocation3 + $0xd4] ss:$8 sps:$4 sm:$0xff]  }
 0x102   :  { %v246_v4 = vpack.c.bf16 %v2266_v1, %v2262_v63  ;;  %v208_v5 = vadd.f32 %v2023_v3, %v2757_v45  ;;  %v199_v6 = vpop.f32.mrb[9].mxu0  ;;  %v2181_v63 = vld [vmem:[#allocation3 + $0xc0] ss:$8 sps:$4 sm:$0xff]   ;;  %v2184_v1 = vld [vmem:[#allocation3 + $0xd0] ss:$8 sps:$4 sm:$0xff]  }
 0x103   :  { %v200_v8 = vadd.f32 %v2757_v45, %v199_v6  ;;  %v2024_v9 = vpop.f32.mrb[10].mxu0  ;;  %v2187_v3 = vld [vmem:[#allocation3 + $0xe0] ss:$8 sps:$4 sm:$0xff]   ;;  %v272_v6 = vlaneseq }
 0x104   :  { %1825 = vmatmul.mubr.msk.bf16.vlgmr.msra.gmra.mrb[0].mxu1 %vm372_vm1, %v246_v4  ;;  %1833 = vmatmul.mubr.msk.bf16.vlgmr.msra.gmra.mrb[16].mxu0 %vm372_vm1, %v246_v4  ;;  %2275 = vtanh.f32 %v208_v5  ;;  %v211_v11 = vadd.f32 %v2024_v9, %v2757_v45  ;;  %v202_v12 = vpop.f32.mrb[11].mxu0  ;;  %v2190_v4 = vld [vmem:[#allocation3 + $0xf0] ss:$8 sps:$4 sm:$0xff]   ;;  %v2195_v5 = vld [vmem:[#allocation3 + $0x104] ss:$8 sps:$4 sm:$0xff]  }
 0x105   :  { %439 = vmatprep.mubr.bf16.mxu1 %v2554_v43  ;;  %552 = vmatprep.mubr.bf16.mxu0 %v2554_v43  ;;  %2277 = vtanh.f32 %v200_v8  ;;  %v203_v13 = vadd.f32 %v2757_v45, %v202_v12 }
 0x106   :  { %v2268_v14 = vpop.eup %2267  ;;  %2279 = vtanh.f32 %v211_v11  ;;  %1116 = vmatpush1.bf16.msra.mxu1 %v2145_v7  ;;  %v2805_v7 = vshrl.u32 %v272_v6, 7 }
 0x107   :  { %v2270_v16 = vpop.eup %2269  ;;  %2281 = vtanh.f32 %v203_v13  ;;  %1117 = vmatprep.subr.bf16.mxu1 %v2150_v10  ;;  %v270_v10 = vld [vmem:[%s3157_s4] sm:$0xf] }
 0x108   :  { %v2272_v18 = vpop.eup %2271  ;;  %v2808_v8 = vsub.s32 0, %v2805_v7  ;;  %v282_v9 = vsub.s32 2, %v2805_v7  ;;  %v278_v11 = vsub.s32 1, %v2805_v7  ;;  %v286_v12 = vsub.s32 3, %v2805_v7 }
 0x109   :  { %v2274_v19 = vpop.eup %2273  ;;  %v249_v20 = vpack.c.bf16 %v2272_v18, %v2268_v14  ;;  %v2027_v21 = vpop.f32.mrb[12].mxu0 }
 0x10a   :  { %v248_v22 = vpack.c.bf16 %v2274_v19, %v2270_v16  ;;  %v224_v23 = vadd.f32 %v2027_v21, %v2757_v45  ;;  %v215_v24 = vpop.f32.mrb[13].mxu0  ;;  %1118 = vmatpush1.bf16.msra.mxu1 %v2148_v15  ;;  %v2817_v13 = vrot.slane %v270_v10, %v2808_v8  ;;  %v2819_v14 = vrot.slane %v270_v10, %v282_v9 }
 0x10b   :  { %v216_v26 = vadd.f32 %v2757_v45, %v215_v24  ;;  %v2028_v27 = vpop.f32.mrb[14].mxu0  ;;  %1119 = vmatprep.subr.bf16.mxu1 %v2153_v17  ;;  %v2823_v15 = vrot.slane %v270_v10, %v278_v11  ;;  %v2825_v16 = vrot.slane %v270_v10, %v286_v12 }
 0x10c   :  { %1826 = vmatmul.mubr.msk.bf16.gmra.mrb[4].mxu1 %vm372_vm1, %v247_v2  ;;  %1834 = vmatmul.mubr.msk.bf16.gmra.mrb[20].mxu0 %vm372_vm1, %v247_v2  ;;  %2283 = vtanh.f32 %v224_v23  ;;  %v227_v29 = vadd.f32 %v2028_v27, %v2757_v45  ;;  %v218_v30 = vpop.f32.mrb[15].mxu0  ;;  %v2189_v2 = vld [vmem:[#allocation3 + $0xe4] ss:$8 sps:$4 sm:$0xff]  }
 0x10d   :  { %449 = vmatprep.mubr.bf16.mxu1 %v2554_v43  ;;  %562 = vmatprep.mubr.bf16.mxu0 %v2554_v43  ;;  %2285 = vtanh.f32 %v216_v26  ;;  %v219_v31 = vadd.f32 %v2757_v45, %v218_v30 }
 0x10e   :  { %v2276_v32 = vpop.eup %2275  ;;  %2287 = vtanh.f32 %v227_v29  ;;  %1120 = vmatpush1.bf16.msra.mxu1 %v2151_v25 }
 0x10f   :  { %v2278_v34 = vpop.eup %2277  ;;  %2289 = vtanh.f32 %v219_v31  ;;  %1121 = vmatprep.subr.bf16.mxu1 %v2156_v28 }
 0x110   :  { %v2280_v36 = vpop.eup %2279 }
 0x111   :  { %v2282_v37 = vpop.eup %2281  ;;  %v251_v38 = vpack.c.bf16 %v2280_v36, %v2276_v32 }
 0x112   :  { %v250_v39 = vpack.c.bf16 %v2282_v37, %v2278_v34  ;;  %1122 = vmatpush1.bf16.msra.mxu1 %v2154_v33 }
 0x113   :  { %1123 = vmatprep.subr.bf16.mxu1 %v2159_v35 }
 0x114   :  { %1827 = vmatmul.mubr.msk.bf16.gmra.mrb[8].mxu1 %vm372_vm1, %v248_v22  ;;  %1835 = vmatmul.mubr.msk.bf16.gmra.mrb[24].mxu0 %vm372_vm1, %v248_v22 }
 0x115   :  { %459 = vmatprep.mubr.bf16.mxu1 %v2554_v43  ;;  %572 = vmatprep.mubr.bf16.mxu0 %v2554_v43 }
 0x116   :  { %v2284_v42 = vpop.eup %2283  ;;  %1124 = vmatpush1.bf16.msra.mxu1 %v2157_v40 }
 0x117   :  { %v2286_v45 = vpop.eup %2285  ;;  %1125 = vmatprep.subr.bf16.mxu1 %v2162_v41 }
 0x118   :  { %v2288_v47 = vpop.eup %2287 }
 0x119   :  { %v2290_v48 = vpop.eup %2289  ;;  %v253_v49 = vpack.c.bf16 %v2288_v47, %v2284_v42 }
 0x11a   :  { %v252_v50 = vpack.c.bf16 %v2290_v48, %v2286_v45  ;;  %1126 = vmatpush1.bf16.msra.mxu1 %v2160_v44 }
 0x11b   :  { %1127 = vmatprep.subr.bf16.mxu1 %v2165_v46 }
 0x11c   :  { %1828 = vmatmul.mubr.msk.bf16.gmra.mrb[12].mxu1 %vm372_vm1, %v249_v20  ;;  %1836 = vmatmul.mubr.msk.bf16.gmra.mrb[28].mxu0 %vm372_vm1, %v249_v20 }
 0x11d   :  { %469 = vmatprep.mubr.bf16.mxu1 %v2554_v43  ;;  %582 = vmatprep.mubr.bf16.mxu0 %v2554_v43 }
 0x11e   :  { %1128 = vmatpush1.bf16.msra.mxu1 %v2163_v51 }
 0x11f   :  { %1129 = vmatprep.subr.bf16.mxu1 %v2168_v52 }
 0x122   :  { %1130 = vmatpush1.bf16.msra.mxu1 %v2166_v53  ;;  %v2241_v53 = vld [vmem:[%s3160_s7 + $0x40] sm:$0xff]  }
 0x123   :  { %1131 = vmatprep.subr.bf16.mxu1 %v2171_v54  ;;  %v2242_v54 = vld [vmem:[%s3160_s7] sm:$0xff]   ;;  %1935 = vmatprep.subr.bf16.mxu0 %v2241_v53 }
 0x124   :  { %1829 = vmatmul.mubr.msk.bf16.gmra.mrb[16].mxu1 %vm372_vm1, %v250_v39  ;;  %1837 = vmatmul.mubr.msk.bf16.gmra.mrb[32].mxu0 %vm372_vm1, %v250_v39 }
 0x125   :  { %479 = vmatprep.mubr.bf16.mxu1 %v2554_v43  ;;  %592 = vmatprep.mubr.bf16.mxu0 %v2554_v43 }
 0x126   :  { %1132 = vmatpush1.bf16.msra.mxu1 %v2169_v55  ;;  %v2243_v55 = vld [vmem:[%s3160_s7 + $0x48] sm:$0xff]   ;;  %1936 = vmatpush3.bf16.msra.mxu0 %v2242_v54 }
 0x127   :  { %1133 = vmatprep.subr.bf16.mxu1 %v2174_v56  ;;  %1937 = vmatprep.subr.bf16.mxu0 %v2243_v55 }
 0x12a   :  { %1134 = vmatpush1.bf16.msra.mxu1 %v2172_v57 }
 0x12b   :  { %1135 = vmatprep.subr.bf16.mxu1 %v2177_v58 }
 0x12c   :  { %1830 = vmatmul.mubr.msk.bf16.gmra.mrb[20].mxu1 %vm372_vm1, %v251_v38  ;;  %1838 = vmatmul.mubr.msk.bf16.gmra.mrb[36].mxu0 %vm372_vm1, %v251_v38 }
 0x12d   :  { %489 = vmatprep.mubr.bf16.mxu1 %v2554_v43  ;;  %602 = vmatprep.mubr.bf16.mxu0 %v2554_v43 }
 0x12e   :  { %1136 = vmatpush1.bf16.msra.mxu1 %v2175_v59 }
 0x12f   :  { %1137 = vmatprep.subr.bf16.mxu1 %v2180_v60 }
 0x132   :  { %1138 = vmatpush1.bf16.msra.mxu1 %v2178_v61 }
 0x133   :  { %1139 = vmatprep.subr.bf16.mxu1 %v2183_v62 }
 0x134   :  { %1831 = vmatmul.mubr.msk.bf16.gmra.mrb[24].mxu1 %vm372_vm1, %v252_v50  ;;  %1839 = vmatmul.mubr.msk.bf16.gmra.mrb[40].mxu0 %vm372_vm1, %v252_v50 }
 0x135   :  { %499 = vmatprep.mubr.bf16.mxu1 %v2554_v43  ;;  %612 = vmatprep.mubr.bf16.mxu0 %v2554_v43  ;;  %v2192_v43 = vld [vmem:[#allocation3 + $0xf4] ss:$8 sps:$4 sm:$0xff]  }
 0x136   :  { %1140 = vmatpush1.bf16.msra.mxu1 %v2181_v63 }
 0x137   :  { %1141 = vmatprep.subr.bf16.mxu1 %v2186_v0 }
 0x13a   :  { %1142 = vmatpush1.bf16.msra.mxu1 %v2184_v1 }
 0x13b   :  { %1143 = vmatprep.subr.bf16.mxu1 %v2189_v2 }
 0x13c   :  { %1832 = vmatmul.mubr.msk.bf16.gmra.mrb[28].mxu1 %vm372_vm1, %v253_v49  ;;  %1840 = vmatmul.mubr.msk.bf16.gmra.mrb[44].mxu0 %vm372_vm1, %v253_v49 }
 0x13e   :  { %1144 = vmatpush1.bf16.msra.mxu1 %v2187_v3 }
 0x13f   :  { %1145 = vmatprep.subr.bf16.mxu1 %v2192_v43 }
 0x142   :  { %1146 = vmatpush1.bf16.msra.mxu1 %v2190_v4 }
 0x143   :  { %1228 = vmatprep.subr.bf16.mxu1 %v2195_v5  ;;  %v2244_v5 = vld [vmem:[%s3160_s7 + $0x8] sm:$0xff]  }
 0x144   :  { %1938 = vmatpush3.bf16.msra.mxu0 %v2244_v5 }
 0x1d7   :  { %v431_v17 = vpop.f32.mrb[0].mxu1  ;;  %v544_v18 = vpop.f32.mrb[16].mxu0 }
 0x1d8   :  { %v432_v19 = vadd.f32 %v431_v17, %v2817_v13  ;;  %v545_v20 = vadd.f32 %v544_v18, %v2819_v14  ;;  %v433_v21 = vpop.f32.mrb[1].mxu1  ;;  %v546_v22 = vpop.f32.mrb[17].mxu0  ;;  %v2245_v18 = vld [vmem:[%s3160_s7 + $0x50] sm:$0xff]  }
 0x1d9   :  { %v434_v23 = vadd.f32 %v433_v21, %v2823_v15  ;;  %v547_v24 = vadd.f32 %v546_v22, %v2825_v16  ;;  %v435_v25 = vpop.f32.mrb[2].mxu1  ;;  %v548_v26 = vpop.f32.mrb[18].mxu0  ;;  %v2193_v22 = vld [vmem:[#allocation3 + $0x100] ss:$8 sps:$4 sm:$0xff]   ;;  %1939 = vmatprep.subr.bf16.mxu0 %v2245_v18  ;;  %v2202_v18 = vld [vmem:[#allocation3 + $0x130] ss:$8 sps:$4 sm:$0xff]  }
 0x1da   :  { %2291 = vtanh.f32 %v432_v19  ;;  %v436_v27 = vadd.f32 %v435_v25, %v2817_v13  ;;  %v437_v28 = vpop.f32.mrb[3].mxu1  ;;  %v550_v29 = vpop.f32.mrb[19].mxu0  ;;  %v549_v30 = vadd.f32 %v548_v26, %v2819_v14  ;;  %v2198_v25 = vld [vmem:[#allocation3 + $0x114] ss:$8 sps:$4 sm:$0xff]  }
 0x1db   :  { %2293 = vtanh.f32 %v545_v20  ;;  %v438_v31 = vadd.f32 %v437_v28, %v2823_v15  ;;  %v551_v32 = vadd.f32 %v550_v29, %v2825_v16  ;;  %v2246_v29 = vld [vmem:[%s3160_s7 + $0x10] sm:$0xff]  }
 0x1dc   :  { %2295 = vtanh.f32 %v434_v23  ;;  %1940 = vmatpush3.bf16.msra.mxu0 %v2246_v29 }
 0x1dd   :  { %2297 = vtanh.f32 %v547_v24 }
 0x1de   :  { %2299 = vtanh.f32 %v436_v27 }
 0x1df   :  { %2301 = vtanh.f32 %v549_v30  ;;  %v441_v33 = vpop.f32.mrb[4].mxu1  ;;  %v554_v34 = vpop.f32.mrb[20].mxu0 }
 0x1e0   :  { %2303 = vtanh.f32 %v438_v31  ;;  %v442_v35 = vadd.f32 %v441_v33, %v2817_v13  ;;  %v555_v36 = vadd.f32 %v554_v34, %v2819_v14  ;;  %v443_v37 = vpop.f32.mrb[5].mxu1  ;;  %v556_v38 = vpop.f32.mrb[21].mxu0  ;;  %v2247_v31 = vld [vmem:[%s3160_s7 + $0x58] sm:$0xff]  }
 0x1e1   :  { %2305 = vtanh.f32 %v551_v32  ;;  %v444_v39 = vadd.f32 %v443_v37, %v2823_v15  ;;  %v557_v40 = vadd.f32 %v556_v38, %v2825_v16  ;;  %v445_v41 = vpop.f32.mrb[6].mxu1  ;;  %v558_v42 = vpop.f32.mrb[22].mxu0  ;;  %1941 = vmatprep.subr.bf16.mxu0 %v2247_v31 }
 0x1e2   :  { %2307 = vtanh.f32 %v442_v35  ;;  %v446_v44 = vadd.f32 %v445_v41, %v2817_v13  ;;  %v447_v45 = vpop.f32.mrb[7].mxu1  ;;  %v560_v46 = vpop.f32.mrb[23].mxu0  ;;  %v559_v47 = vadd.f32 %v558_v42, %v2819_v14  ;;  %v2196_v35 = vld [vmem:[#allocation3 + $0x110] ss:$8 sps:$4 sm:$0xff]   ;;  %v2201_v41 = vld [vmem:[#allocation3 + $0x124] ss:$8 sps:$4 sm:$0xff]  }
 0x1e3   :  { %2309 = vtanh.f32 %v555_v36  ;;  %v448_v49 = vadd.f32 %v447_v45, %v2823_v15  ;;  %v561_v51 = vadd.f32 %v560_v46, %v2825_v16 }
 0x1e4   :  { %v2292_v48 = vpop.eup %2291  ;;  %2311 = vtanh.f32 %v444_v39 }
 0x1e5   :  { %v2842_v50 = vpop.eup %2293  ;;  %2313 = vtanh.f32 %v557_v40 }
 0x1e6   :  { %v2296_v52 = vpop.eup %2295  ;;  %2315 = vtanh.f32 %v446_v44 }
 0x1e7   :  { %v2854_v56 = vpop.eup %2297  ;;  %2317 = vtanh.f32 %v559_v47  ;;  %v451_v57 = vpop.f32.mrb[8].mxu1 }
 0x1e8   :  { %v564_v58 = vpop.f32.mrb[24].mxu0  ;;  %v2300_v59 = vpop.eup %2299  ;;  %2319 = vtanh.f32 %v448_v49  ;;  %v452_v60 = vadd.f32 %v451_v57, %v2817_v13  ;;  %v2248_v49 = vld [vmem:[%s3160_s7 + $0x18] sm:$0xff]   ;;  %v2249_v57 = vld [vmem:[%s3160_s7 + $0x60] sm:$0xff]  }
 0x1e9   :  { %v565_v61 = vadd.f32 %v564_v58, %v2819_v14  ;;  %v453_v62 = vpop.f32.mrb[9].mxu1  ;;  %v566_v63 = vpop.f32.mrb[25].mxu0  ;;  %2321 = vtanh.f32 %v561_v51  ;;  %v687_v4 = vpack.c.bf16 %v2300_v59, %v2292_v48  ;;  %1942 = vmatpush3.bf16.msra.mxu0 %v2248_v49  ;;  %v2210_v49 = vld [vmem:[#allocation3 + $0x154] ss:$8 sps:$4 sm:$0xff]  }
 0x1ea   :  { %v2858_v0 = vpop.eup %2301  ;;  %v454_v1 = vadd.f32 %v453_v62, %v2823_v15  ;;  %v567_v2 = vadd.f32 %v566_v63, %v2825_v16  ;;  %v455_v3 = vpop.f32.mrb[10].mxu1  ;;  %2323 = vtanh.f32 %v452_v60  ;;  %1943 = vmatprep.subr.bf16.mxu0 %v2249_v57 }
 0x1eb   :  { %v568_v43 = vpop.f32.mrb[26].mxu0  ;;  %v2304_v6 = vpop.eup %2303  ;;  %v456_v9 = vadd.f32 %v455_v3, %v2817_v13  ;;  %v689_v17 = vpack.c.bf16 %v2858_v0, %v2842_v50  ;;  %2325 = vtanh.f32 %v565_v61  ;;  %v2199_v61 = vld [vmem:[#allocation3 + $0x120] ss:$8 sps:$4 sm:$0xff]   ;;  %v2253_v50 = vld [vmem:[%s3160_s7 + $0x70] sm:$0xff]   ;;  %v2255_v0 = vld [vmem:[%s3160_s7 + $0x78] sm:$0xff]  }
 0x1ec   :  { %v457_v10 = vpop.f32.mrb[11].mxu1  ;;  %v570_v12 = vpop.f32.mrb[27].mxu0  ;;  %v569_v20 = vadd.f32 %v568_v43, %v2819_v14  ;;  %v688_v21 = vpack.c.bf16 %v2304_v6, %v2296_v52  ;;  %2327 = vtanh.f32 %v454_v1  ;;  %v2204_v1 = vld [vmem:[#allocation3 + $0x134] ss:$8 sps:$4 sm:$0xff]   ;;  %v2251_v6 = vld [vmem:[%s3160_s7 + $0x68] sm:$0xff]  }
 0x1ed   :  { %v2871_v19 = vpop.eup %2305  ;;  %v458_v24 = vadd.f32 %v457_v10, %v2823_v15  ;;  %2329 = vtanh.f32 %v567_v2  ;;  %v571_v28 = vadd.f32 %v570_v12, %v2825_v16 }
 0x1ee   :  { %v2874_v23 = vpop.eup %2307  ;;  %v690_v26 = vpack.c.bf16 %v2871_v19, %v2854_v56  ;;  %1147 = vmatprep.mubr.bf16.mxu1 %v688_v21  ;;  %2331 = vtanh.f32 %v456_v9  ;;  %v2254_v56 = vld [vmem:[%s3160_s7 + $0x30] sm:$0xff]   ;;  %v783_v19 = vld [vmem:[%s3159_s6] sm:$0x3] }
 0x1ef   :  { %v2879_v27 = vpop.eup %2309  ;;  %1148 = vmatmul.mubr.bf16.vlgmr.msra.gmra.mrb[32].mxu1 %v687_v4  ;;  %2333 = vtanh.f32 %v569_v20  ;;  %v461_v33 = vpop.f32.mrb[12].mxu1  ;;  %v2250_v4 = vld [vmem:[%s3160_s7 + $0x20] sm:$0xff]  }
 0x1f0   :  { %v2312_v30 = vpop.eup %2311  ;;  %1229 = vmatpush1.bf16.msra.mxu1 %v2193_v22  ;;  %v574_v34 = vpop.f32.mrb[28].mxu0  ;;  %2335 = vtanh.f32 %v458_v24  ;;  %v462_v37 = vadd.f32 %v461_v33, %v2817_v13  ;;  %1944 = vmatpush3.bf16.msra.mxu0 %v2250_v4 }
 0x1f1   :  { %v2888_v32 = vpop.eup %2313  ;;  %v575_v38 = vadd.f32 %v574_v34, %v2819_v14  ;;  %1230 = vmatprep.subr.bf16.mxu1 %v2198_v25  ;;  %v463_v39 = vpop.f32.mrb[13].mxu1  ;;  %2337 = vtanh.f32 %v571_v28  ;;  %v2207_v25 = vld [vmem:[#allocation3 + $0x144] ss:$8 sps:$4 sm:$0xff]   ;;  %1945 = vmatprep.subr.bf16.mxu0 %v2251_v6 }
 0x1f2   :  { %v2316_v36 = vpop.eup %2315  ;;  %v576_v40 = vpop.f32.mrb[29].mxu0  ;;  %v464_v44 = vadd.f32 %v463_v39, %v2823_v15  ;;  %2339 = vtanh.f32 %v462_v37 }
 0x1f3   :  { %v2892_v42 = vpop.eup %2317  ;;  %v577_v45 = vadd.f32 %v576_v40, %v2825_v16  ;;  %v465_v46 = vpop.f32.mrb[14].mxu1  ;;  %v691_v48 = vpack.c.bf16 %v2316_v36, %v2874_v23  ;;  %2341 = vtanh.f32 %v575_v38 }
 0x1f4   :  { %v578_v47 = vpop.f32.mrb[30].mxu0  ;;  %v2320_v51 = vpop.eup %2319  ;;  %v466_v52 = vadd.f32 %v465_v46, %v2817_v13  ;;  %v693_v55 = vpack.c.bf16 %v2892_v42, %v2879_v27  ;;  %1231 = vmatpush1.bf16.msra.mxu1 %v2196_v35  ;;  %2343 = vtanh.f32 %v464_v44  ;;  %v2252_v35 = vld [vmem:[%s3160_s7 + $0x28] sm:$0xff]   ;;  %v3064_v27 = vrot.slane %v783_v19, %v278_v11 }
 0x1f5   :  { %v467_v53 = vpop.f32.mrb[15].mxu1  ;;  %v580_v54 = vpop.f32.mrb[31].mxu0  ;;  %v579_v59 = vadd.f32 %v578_v47, %v2819_v14  ;;  %v692_v60 = vpack.c.bf16 %v2320_v51, %v2312_v30  ;;  %1232 = vmatprep.subr.bf16.mxu1 %v2201_v41  ;;  %2345 = vtanh.f32 %v577_v45  ;;  %v2205_v46 = vld [vmem:[#allocation3 + $0x140] ss:$8 sps:$4 sm:$0xff]   ;;  %1946 = vmatpush3.bf16.msra.mxu0 %v2252_v35 }
 0x1f6   :  { %v2906_v58 = vpop.eup %2321  ;;  %v468_v63 = vadd.f32 %v467_v53, %v2823_v15  ;;  %v581_v43 = vadd.f32 %v580_v54, %v2825_v16  ;;  %2347 = vtanh.f32 %v466_v52  ;;  %1947 = vmatprep.subr.bf16.mxu0 %v2253_v50 }
 0x1f7   :  { %v2909_v62 = vpop.eup %2323  ;;  %v694_v2 = vpack.c.bf16 %v2906_v58, %v2888_v32  ;;  %1157 = vmatprep.mubr.bf16.mxu1 %v692_v60  ;;  %2349 = vtanh.f32 %v579_v59  ;;  %v471_v10 = vpop.f32.mrb[16].mxu1 }
 0x1f8   :  { %v2914_v3 = vpop.eup %2325  ;;  %1158 = vmatmul.mubr.bf16.gmra.mrb[36].mxu1 %v691_v48  ;;  %v584_v12 = vpop.f32.mrb[32].mxu0  ;;  %2351 = vtanh.f32 %v468_v63  ;;  %v472_v21 = vadd.f32 %v471_v10, %v2817_v13 }
 0x1f9   :  { %v2328_v5 = vpop.eup %2327  ;;  %1233 = vmatpush1.bf16.msra.mxu1 %v2199_v61  ;;  %v585_v22 = vadd.f32 %v584_v12, %v2819_v14  ;;  %v473_v23 = vpop.f32.mrb[17].mxu1  ;;  %2353 = vtanh.f32 %v581_v43  ;;  %v2208_v61 = vld [vmem:[#allocation3 + $0x150] ss:$8 sps:$4 sm:$0xff]   ;;  %1948 = vmatpush3.bf16.msra.mxu0 %v2254_v56 }
 0x1fa   :  { %v2923_v9 = vpop.eup %2329  ;;  %1234 = vmatprep.subr.bf16.mxu1 %v2204_v1  ;;  %v586_v24 = vpop.f32.mrb[33].mxu0  ;;  %v474_v29 = vadd.f32 %v473_v23, %v2823_v15  ;;  %2355 = vtanh.f32 %v472_v21  ;;  %1949 = vmatprep.subr.bf16.mxu0 %v2255_v0 }
 0x1fb   :  { %v2332_v20 = vpop.eup %2331  ;;  %v587_v30 = vadd.f32 %v586_v24, %v2825_v16  ;;  %v475_v31 = vpop.f32.mrb[18].mxu1  ;;  %2357 = vtanh.f32 %v585_v22 }
 0x1fc   :  { %v2927_v28 = vpop.eup %2333  ;;  %v588_v33 = vpop.f32.mrb[34].mxu0  ;;  %v695_v34 = vpack.c.bf16 %v2332_v20, %v2909_v62  ;;  %v476_v37 = vadd.f32 %v475_v31, %v2817_v13  ;;  %2359 = vtanh.f32 %v474_v29 }
 0x1fd   :  { %v2336_v36 = vpop.eup %2335  ;;  %v477_v38 = vpop.f32.mrb[19].mxu1  ;;  %v697_v40 = vpack.c.bf16 %v2927_v28, %v2914_v3  ;;  %1235 = vmatpush1.bf16.msra.mxu1 %v2202_v18  ;;  %v589_v44 = vadd.f32 %v588_v33, %v2819_v14  ;;  %2361 = vtanh.f32 %v587_v30 }
 0x1fe   :  { %v590_v39 = vpop.f32.mrb[35].mxu0  ;;  %v2938_v41 = vpop.eup %2337  ;;  %v696_v45 = vpack.c.bf16 %v2336_v36, %v2328_v5  ;;  %v478_v48 = vadd.f32 %v477_v38, %v2823_v15  ;;  %1236 = vmatprep.subr.bf16.mxu1 %v2207_v25  ;;  %2363 = vtanh.f32 %v476_v37  ;;  %v2213_v5 = vld [vmem:[#allocation3 + $0x164] ss:$8 sps:$4 sm:$0xff]   ;;  %v2216_v37 = vld [vmem:[#allocation3 + $0x174] ss:$8 sps:$4 sm:$0xff]  }
 0x1ff   :  { %v2340_v47 = vpop.eup %2339  ;;  %v698_v51 = vpack.c.bf16 %v2938_v41, %v2923_v9  ;;  %v591_v53 = vadd.f32 %v590_v39, %v2825_v16  ;;  %2365 = vtanh.f32 %v589_v44  ;;  %v481_v59 = vpop.f32.mrb[20].mxu1 }
 0x200   :  { %v2944_v52 = vpop.eup %2341  ;;  %1167 = vmatprep.mubr.bf16.mxu1 %v696_v45  ;;  %v594_v60 = vpop.f32.mrb[36].mxu0  ;;  %2367 = vtanh.f32 %v478_v48  ;;  %v482_v63 = vadd.f32 %v481_v59, %v2817_v13 }
 0x201   :  { %v2344_v54 = vpop.eup %2343  ;;  %1168 = vmatmul.mubr.bf16.gmra.mrb[40].mxu1 %v695_v34  ;;  %v595_v1 = vadd.f32 %v594_v60, %v2819_v14  ;;  %v483_v43 = vpop.f32.mrb[21].mxu1  ;;  %2369 = vtanh.f32 %v591_v53  ;;  %v2211_v34 = vld [vmem:[#allocation3 + $0x160] ss:$8 sps:$4 sm:$0xff]  }
 0x202   :  { %v2947_v57 = vpop.eup %2345  ;;  %1237 = vmatpush1.bf16.msra.mxu1 %v2205_v46  ;;  %v596_v4 = vpop.f32.mrb[37].mxu0  ;;  %v484_v10 = vadd.f32 %v483_v43, %v2823_v15  ;;  %2371 = vtanh.f32 %v482_v63 }
 0x203   :  { %v2348_v62 = vpop.eup %2347  ;;  %1238 = vmatprep.subr.bf16.mxu1 %v2210_v49  ;;  %v597_v12 = vadd.f32 %v596_v4, %v2825_v16  ;;  %v485_v18 = vpop.f32.mrb[22].mxu1  ;;  %2373 = vtanh.f32 %v595_v1  ;;  %v2214_v49 = vld [vmem:[#allocation3 + $0x170] ss:$8 sps:$4 sm:$0xff]  }
 0x204   :  { %v2951_v6 = vpop.eup %2349  ;;  %v598_v20 = vpop.f32.mrb[38].mxu0  ;;  %v699_v21 = vpack.c.bf16 %v2348_v62, %v2340_v47  ;;  %v486_v23 = vadd.f32 %v485_v18, %v2817_v13  ;;  %2375 = vtanh.f32 %v484_v10  ;;  %v2219_v62 = vld [vmem:[#allocation3 + $0x184] ss:$8 sps:$4 sm:$0xff]  }
 0x205   :  { %v2352_v22 = vpop.eup %2351  ;;  %v487_v24 = vpop.f32.mrb[23].mxu1  ;;  %v701_v29 = vpack.c.bf16 %v2951_v6, %v2944_v52  ;;  %v599_v31 = vadd.f32 %v598_v20, %v2819_v14  ;;  %2377 = vtanh.f32 %v597_v12 }
 0x206   :  { %v600_v25 = vpop.f32.mrb[39].mxu0  ;;  %v2958_v30 = vpop.eup %2353  ;;  %1239 = vmatpush1.bf16.msra.mxu1 %v2208_v61  ;;  %v700_v33 = vpack.c.bf16 %v2352_v22, %v2344_v54  ;;  %v488_v36 = vadd.f32 %v487_v24, %v2823_v15  ;;  %2379 = vtanh.f32 %v486_v23 }
 0x207   :  { %v2356_v35 = vpop.eup %2355  ;;  %1240 = vmatprep.subr.bf16.mxu1 %v2213_v5  ;;  %v702_v38 = vpack.c.bf16 %v2958_v30, %v2947_v57  ;;  %v601_v44 = vadd.f32 %v600_v25, %v2825_v16  ;;  %2381 = vtanh.f32 %v599_v31  ;;  %v491_v47 = vpop.f32.mrb[24].mxu1  ;;  %v2217_v31 = vld [vmem:[#allocation3 + $0x180] ss:$8 sps:$4 sm:$0xff]  }
 0x208   :  { %v2964_v39 = vpop.eup %2357  ;;  %1177 = vmatprep.mubr.bf16.mxu1 %v700_v33  ;;  %v604_v48 = vpop.f32.mrb[40].mxu0  ;;  %2383 = vtanh.f32 %v488_v36  ;;  %v492_v54 = vadd.f32 %v491_v47, %v2817_v13 }
 0x209   :  { %v2360_v45 = vpop.eup %2359  ;;  %1178 = vmatmul.mubr.bf16.gmra.mrb[44].mxu1 %v699_v21  ;;  %v605_v59 = vadd.f32 %v604_v48, %v2819_v14  ;;  %v493_v60 = vpop.f32.mrb[25].mxu1  ;;  %2385 = vtanh.f32 %v601_v44 }
 0x20a   :  { %v2967_v46 = vpop.eup %2361  ;;  %1241 = vmatpush1.bf16.msra.mxu1 %v2211_v34  ;;  %v606_v61 = vpop.f32.mrb[41].mxu0  ;;  %v494_v1 = vadd.f32 %v493_v60, %v2823_v15  ;;  %2387 = vtanh.f32 %v492_v54 }
 0x20b   :  { %v2364_v53 = vpop.eup %2363  ;;  %1242 = vmatprep.subr.bf16.mxu1 %v2216_v37  ;;  %v607_v43 = vadd.f32 %v606_v61, %v2825_v16  ;;  %v495_v4 = vpop.f32.mrb[26].mxu1  ;;  %2389 = vtanh.f32 %v605_v59 }
 0x20c   :  { %v2971_v63 = vpop.eup %2365  ;;  %v608_v5 = vpop.f32.mrb[42].mxu0  ;;  %v703_v10 = vpack.c.bf16 %v2364_v53, %v2356_v35  ;;  %v496_v18 = vadd.f32 %v495_v4, %v2817_v13  ;;  %2391 = vtanh.f32 %v494_v1  ;;  %v2222_v35 = vld [vmem:[#allocation3 + $0x194] ss:$8 sps:$4 sm:$0xff]   ;;  %v2220_v53 = vld [vmem:[#allocation3 + $0x190] ss:$8 sps:$4 sm:$0xff]  }
 0x20d   :  { %v2368_v12 = vpop.eup %2367  ;;  %v497_v20 = vpop.f32.mrb[27].mxu1  ;;  %v705_v22 = vpack.c.bf16 %v2971_v63, %v2964_v39  ;;  %v609_v24 = vadd.f32 %v608_v5, %v2819_v14  ;;  %2393 = vtanh.f32 %v607_v43  ;;  %v2225_v1 = vld [vmem:[#allocation3 + $0x1a4] ss:$8 sps:$4 sm:$0xff]  }
 0x20e   :  { %v610_v21 = vpop.f32.mrb[43].mxu0  ;;  %v2978_v23 = vpop.eup %2369  ;;  %1243 = vmatpush1.bf16.msra.mxu1 %v2214_v49  ;;  %v704_v25 = vpack.c.bf16 %v2368_v12, %v2360_v45  ;;  %v498_v34 = vadd.f32 %v497_v20, %v2823_v15  ;;  %2395 = vtanh.f32 %v496_v18 }
 0x20f   :  { %v2372_v33 = vpop.eup %2371  ;;  %1244 = vmatprep.subr.bf16.mxu1 %v2219_v62  ;;  %v706_v36 = vpack.c.bf16 %v2978_v23, %v2967_v46  ;;  %v611_v44 = vadd.f32 %v610_v21, %v2825_v16  ;;  %2397 = vtanh.f32 %v609_v24  ;;  %v501_v48 = vpop.f32.mrb[28].mxu1 }
 0x210   :  { %v2984_v37 = vpop.eup %2373  ;;  %1187 = vmatprep.mubr.bf16.mxu1 %v704_v25  ;;  %v614_v49 = vpop.f32.mrb[44].mxu0  ;;  %2399 = vtanh.f32 %v498_v34  ;;  %v502_v59 = vadd.f32 %v501_v48, %v2817_v13  ;;  %v2223_v48 = vld [vmem:[#allocation3 + $0x1a0] ss:$8 sps:$4 sm:$0xff]  }
 0x211   :  { %v2376_v47 = vpop.eup %2375  ;;  %1188 = vmatmul.mubr.bf16.gmra.mrb[48].mxu1 %v703_v10  ;;  %v615_v60 = vadd.f32 %v614_v49, %v2819_v14  ;;  %v503_v61 = vpop.f32.mrb[29].mxu1  ;;  %2401 = vtanh.f32 %v611_v44 }
 0x212   :  { %v2987_v45 = vpop.eup %2377  ;;  %1245 = vmatpush1.bf16.msra.mxu1 %v2217_v31  ;;  %v616_v62 = vpop.f32.mrb[45].mxu0  ;;  %v504_v4 = vadd.f32 %v503_v61, %v2823_v15  ;;  %2403 = vtanh.f32 %v502_v59 }
 0x213   :  { %v2380_v54 = vpop.eup %2379  ;;  %1246 = vmatprep.subr.bf16.mxu1 %v2222_v35  ;;  %v617_v5 = vadd.f32 %v616_v62, %v2825_v16  ;;  %v505_v10 = vpop.f32.mrb[30].mxu1  ;;  %2405 = vtanh.f32 %v615_v60 }
 0x214   :  { %v2991_v43 = vpop.eup %2381  ;;  %v618_v12 = vpop.f32.mrb[46].mxu0  ;;  %v707_v18 = vpack.c.bf16 %v2380_v54, %v2372_v33  ;;  %v506_v21 = vadd.f32 %v505_v10, %v2817_v13  ;;  %2407 = vtanh.f32 %v504_v4  ;;  %v2228_v54 = vld [vmem:[#allocation3 + $0x1b4] ss:$8 sps:$4 sm:$0xff]  }
 0x215   :  { %v2384_v20 = vpop.eup %2383  ;;  %v507_v24 = vpop.f32.mrb[31].mxu1  ;;  %v709_v31 = vpack.c.bf16 %v2991_v43, %v2984_v37  ;;  %v619_v35 = vadd.f32 %v618_v12, %v2819_v14  ;;  %2409 = vtanh.f32 %v617_v5  ;;  %v2229_v12 = vld [vmem:[#allocation3 + $0x1c0] ss:$8 sps:$4 sm:$0xff]  }
 0x216   :  { %v620_v25 = vpop.f32.mrb[47].mxu0  ;;  %v2998_v34 = vpop.eup %2385  ;;  %1247 = vmatpush1.bf16.msra.mxu1 %v2220_v53  ;;  %v708_v44 = vpack.c.bf16 %v2384_v20, %v2376_v47  ;;  %v508_v33 = vadd.f32 %v507_v24, %v2823_v15  ;;  %2411 = vtanh.f32 %v506_v21  ;;  %v2226_v47 = vld [vmem:[#allocation3 + $0x1b0] ss:$8 sps:$4 sm:$0xff]   ;;  %v2231_v15 = vld [vmem:[#allocation3 + $0x1c4] ss:$8 sps:$4 sm:$0xff]  }
 0x217   :  { %v2388_v49 = vpop.eup %2387  ;;  %1248 = vmatprep.subr.bf16.mxu1 %v2225_v1  ;;  %v710_v13 = vpack.c.bf16 %v2998_v34, %v2987_v45  ;;  %v621_v61 = vadd.f32 %v620_v25, %v2825_v16  ;;  %2413 = vtanh.f32 %v619_v35 }
 0x218   :  { %v3004_v59 = vpop.eup %2389  ;;  %1197 = vmatprep.mubr.bf16.mxu1 %v708_v44  ;;  %2415 = vtanh.f32 %v508_v33  ;;  %v2232_v44 = vld [vmem:[#allocation3 + $0x1d0] ss:$8 sps:$4 sm:$0xff]  }
 0x219   :  { %v2392_v53 = vpop.eup %2391  ;;  %1198 = vmatmul.mubr.bf16.gmra.mrb[52].mxu1 %v707_v18  ;;  %2417 = vtanh.f32 %v621_v61  ;;  %v2234_v18 = vld [vmem:[#allocation3 + $0x1d4] ss:$8 sps:$4 sm:$0xff]  }
 0x21a   :  { %v2394_v14 = vpop.eup %2393  ;;  %1249 = vmatpush1.bf16.msra.mxu1 %v2223_v48 }
 0x21b   :  { %v2396_v60 = vpop.eup %2395  ;;  %1250 = vmatprep.subr.bf16.mxu1 %v2228_v54 }
 0x21c   :  { %v2398_v62 = vpop.eup %2397  ;;  %v711_v1 = vpack.c.bf16 %v2396_v60, %v2388_v49  ;;  %v2237_v49 = vld [vmem:[#allocation3 + $0x1e4] ss:$8 sps:$4 sm:$0xff]   ;;  %v2235_v60 = vld [vmem:[#allocation3 + $0x1e0] ss:$8 sps:$4 sm:$0xff]  }
 0x21d   :  { %v2400_v4 = vpop.eup %2399  ;;  %v713_v5 = vpack.c.bf16 %v2398_v62, %v3004_v59  ;;  %v2238_v62 = vld [vmem:[#allocation3 + $0x1f0] ss:$8 sps:$4 sm:$0xff]  }
 0x21e   :  { %v2402_v10 = vpop.eup %2401  ;;  %1251 = vmatpush1.bf16.msra.mxu1 %v2226_v47  ;;  %v712_v16 = vpack.c.bf16 %v2400_v4, %v2392_v53 }
 0x21f   :  { %v2404_v20 = vpop.eup %2403  ;;  %1252 = vmatprep.subr.bf16.mxu1 %v2231_v15  ;;  %v714_v21 = vpack.c.bf16 %v2402_v10, %v2394_v14  ;;  %v2240_v14 = vld [vmem:[#allocation3 + $0x1f4] ss:$8 sps:$4 sm:$0xff]  }
 0x220   :  { %v2406_v24 = vpop.eup %2405  ;;  %1207 = vmatprep.mubr.bf16.mxu1 %v712_v16 }
 0x221   :  { %v2408_v25 = vpop.eup %2407  ;;  %1208 = vmatmul.mubr.bf16.gmra.mrb[56].mxu1 %v711_v1 }
 0x222   :  { %v2410_v35 = vpop.eup %2409  ;;  %1253 = vmatpush1.bf16.msra.mxu1 %v2229_v12 }
 0x223   :  { %v2412_v48 = vpop.eup %2411  ;;  %1254 = vmatprep.subr.bf16.mxu1 %v2234_v18 }
 0x224   :  { %v2414_v33 = vpop.eup %2413  ;;  %v715_v54 = vpack.c.bf16 %v2412_v48, %v2404_v20 }
 0x225   :  { %v2416_v59 = vpop.eup %2415  ;;  %v717_v61 = vpack.c.bf16 %v2414_v33, %v2406_v24 }
 0x226   :  { %v2418_v53 = vpop.eup %2417  ;;  %1255 = vmatpush1.bf16.msra.mxu1 %v2232_v44  ;;  %v716_v47 = vpack.c.bf16 %v2416_v59, %v2408_v25 }
 0x227   :  { %1256 = vmatprep.subr.bf16.mxu1 %v2237_v49  ;;  %v718_v15 = vpack.c.bf16 %v2418_v53, %v2410_v35 }
 0x228   :  { %1217 = vmatprep.mubr.bf16.mxu1 %v716_v47 }
 0x229   :  { %1218 = vmatmul.mubr.bf16.gmra.mrb[60].mxu1 %v715_v54 }
 0x22a   :  { %1257 = vmatpush1.bf16.msra.mxu1 %v2235_v60  ;;  %1260 = vmatprep.mubr.bf16.mxu1 %v690_v26  ;;  %v3060_v26 = vrot.slane %v783_v19, %v2808_v8 }
 0x22b   :  { %1258 = vmatprep.subr.bf16.mxu1 %v2240_v14 }
 0x22e   :  { %1259 = vmatpush1.bf16.msra.mxu1 %v2238_v62 }
 0x231   :  { %1261 = vmatmul.mubr.bf16.vlgmr.msra.gmra.mrb[32].mxu1 %v689_v17  ;;  %v2256_v17 = vld [vmem:[%s3160_s7 + $0x38] sm:$0xff]  }
 0x232   :  { %1270 = vmatprep.mubr.bf16.mxu1 %v694_v2  ;;  %1950 = vmatpush3.bf16.msra.mxu0 %v2256_v17 }
 0x239   :  { %1271 = vmatmul.mubr.bf16.gmra.mrb[36].mxu1 %v693_v55 }
 0x23a   :  { %1280 = vmatprep.mubr.bf16.mxu1 %v698_v51 }
 0x241   :  { %1281 = vmatmul.mubr.bf16.gmra.mrb[40].mxu1 %v697_v40 }
 0x242   :  { %1290 = vmatprep.mubr.bf16.mxu1 %v702_v38 }
 0x249   :  { %1291 = vmatmul.mubr.bf16.gmra.mrb[44].mxu1 %v701_v29 }
 0x24a   :  { %1300 = vmatprep.mubr.bf16.mxu1 %v706_v36 }
 0x251   :  { %1301 = vmatmul.mubr.bf16.gmra.mrb[48].mxu1 %v705_v22 }
 0x252   :  { %1310 = vmatprep.mubr.bf16.mxu1 %v710_v13 }
 0x259   :  { %1311 = vmatmul.mubr.bf16.gmra.mrb[52].mxu1 %v709_v31 }
 0x25a   :  { %1320 = vmatprep.mubr.bf16.mxu1 %v714_v21 }
 0x261   :  { %1321 = vmatmul.mubr.bf16.gmra.mrb[56].mxu1 %v713_v5 }
 0x262   :  { %1330 = vmatprep.mubr.bf16.mxu1 %v718_v15 }
 0x269   :  { %1331 = vmatmul.mubr.bf16.gmra.mrb[60].mxu1 %v717_v61 }
 0x304   :  { %v1262_v32 = vpop.f32.mrb[32].mxu1 }
 0x305   :  { %v2049_v42 = vadd.f32 %v1262_v32, %v3060_v26  ;;  %v1264_v55 = vpop.f32.mrb[33].mxu1 }
 0x306   :  { %v2050_v58 = vadd.f32 %v1264_v55, %v3064_v27  ;;  %v1266_v2 = vpop.f32.mrb[34].mxu1 }
 0x307   :  { %2419 = vtanh.f32 %v2049_v42  ;;  %v2051_v3 = vadd.f32 %v1266_v2, %v3060_v26  ;;  %v1268_v9 = vpop.f32.mrb[35].mxu1 }
 0x308   :  { %2421 = vtanh.f32 %v2050_v58  ;;  %v2052_v28 = vadd.f32 %v1268_v9, %v3064_v27 }
 0x309   :  { %2423 = vtanh.f32 %v2051_v3 }
 0x30a   :  { %2425 = vtanh.f32 %v2052_v28 }
 0x30c   :  { %v1272_v40 = vpop.f32.mrb[36].mxu1 }
 0x30d   :  { %v2053_v7 = vadd.f32 %v1272_v40, %v3060_v26  ;;  %v1274_v11 = vpop.f32.mrb[37].mxu1 }
 0x30e   :  { %v2054_v41 = vadd.f32 %v1274_v11, %v3064_v27  ;;  %v1276_v51 = vpop.f32.mrb[38].mxu1 }
 0x30f   :  { %2427 = vtanh.f32 %v2053_v7  ;;  %v2055_v52 = vadd.f32 %v1276_v51, %v3060_v26  ;;  %v1278_v57 = vpop.f32.mrb[39].mxu1 }
 0x310   :  { %2429 = vtanh.f32 %v2054_v41  ;;  %v2056_v6 = vadd.f32 %v1278_v57, %v3064_v27 }
 0x311   :  { %v2420_v29 = vpop.eup %2419  ;;  %2431 = vtanh.f32 %v2055_v52 }
 0x312   :  { %v2422_v30 = vpop.eup %2421  ;;  %2433 = vtanh.f32 %v2056_v6 }
 0x313   :  { %v2424_v38 = vpop.eup %2423 }
 0x314   :  { %v2426_v39 = vpop.eup %2425  ;;  %v1282_v46 = vpop.f32.mrb[40].mxu1  ;;  %v1373_v63 = vpack.c.bf16 %v2424_v38, %v2420_v29 }
 0x315   :  { %v2057_v22 = vadd.f32 %v1282_v46, %v3060_v26  ;;  %v1284_v23 = vpop.f32.mrb[41].mxu1  ;;  %v1374_v36 = vpack.c.bf16 %v2426_v39, %v2422_v30 }
 0x316   :  { %v2058_v37 = vadd.f32 %v1284_v23, %v3064_v27  ;;  %v1286_v45 = vpop.f32.mrb[42].mxu1 }
 0x317   :  { %2435 = vtanh.f32 %v2057_v22  ;;  %v2059_v43 = vadd.f32 %v1286_v45, %v3060_v26  ;;  %v1288_v31 = vpop.f32.mrb[43].mxu1  ;;  %1556 = vmatprep.mubr.bf16.mxu0 %v1374_v36 }
 0x318   :  { %2437 = vtanh.f32 %v2058_v37  ;;  %v2060_v34 = vadd.f32 %v1288_v31, %v3064_v27  ;;  %1557 = vmatmul.mubr.bf16.vlgmr.msra.gmra.mrb[48].mxu0 %v1373_v63 }
 0x319   :  { %v2428_v13 = vpop.eup %2427  ;;  %2439 = vtanh.f32 %v2059_v43 }
 0x31a   :  { %v2430_v1 = vpop.eup %2429  ;;  %2441 = vtanh.f32 %v2060_v34 }
 0x31b   :  { %v2432_v4 = vpop.eup %2431 }
 0x31c   :  { %v2434_v5 = vpop.eup %2433  ;;  %v1292_v10 = vpop.f32.mrb[44].mxu1  ;;  %v1375_v16 = vpack.c.bf16 %v2432_v4, %v2428_v13 }
 0x31d   :  { %v2061_v12 = vadd.f32 %v1292_v10, %v3060_v26  ;;  %v1294_v20 = vpop.f32.mrb[45].mxu1  ;;  %v1376_v18 = vpack.c.bf16 %v2434_v5, %v2430_v1 }
 0x31e   :  { %v2062_v21 = vadd.f32 %v1294_v20, %v3064_v27  ;;  %v1296_v24 = vpop.f32.mrb[46].mxu1 }
 0x31f   :  { %2443 = vtanh.f32 %v2061_v12  ;;  %v2063_v25 = vadd.f32 %v1296_v24, %v3060_v26  ;;  %v1298_v35 = vpop.f32.mrb[47].mxu1  ;;  %1564 = vmatprep.mubr.bf16.mxu0 %v1376_v18 }
 0x320   :  { %2445 = vtanh.f32 %v2062_v21  ;;  %v2064_v44 = vadd.f32 %v1298_v35, %v3064_v27  ;;  %1565 = vmatmul.mubr.bf16.gmra.mrb[52].mxu0 %v1375_v16 }
 0x321   :  { %v2436_v48 = vpop.eup %2435  ;;  %2447 = vtanh.f32 %v2063_v25 }
 0x322   :  { %v2438_v49 = vpop.eup %2437  ;;  %2449 = vtanh.f32 %v2064_v44 }
 0x323   :  { %v2440_v33 = vpop.eup %2439 }
 0x324   :  { %v2442_v54 = vpop.eup %2441  ;;  %v1302_v59 = vpop.f32.mrb[48].mxu1  ;;  %v1377_v61 = vpack.c.bf16 %v2440_v33, %v2436_v48 }
 0x325   :  { %v2065_v53 = vadd.f32 %v1302_v59, %v3060_v26  ;;  %v1304_v47 = vpop.f32.mrb[49].mxu1  ;;  %v1378_v60 = vpack.c.bf16 %v2442_v54, %v2438_v49 }
 0x326   :  { %v2066_v14 = vadd.f32 %v1304_v47, %v3064_v27  ;;  %v1306_v15 = vpop.f32.mrb[50].mxu1  ;;  %v1651_v47 = vld [vmem:[%s3163_s10 + $0x10] sm:$0xff] }
 0x327   :  { %2451 = vtanh.f32 %v2065_v53  ;;  %v2067_v62 = vadd.f32 %v1306_v15, %v3060_v26  ;;  %v1308_v50 = vpop.f32.mrb[51].mxu1  ;;  %1572 = vmatprep.mubr.bf16.mxu0 %v1378_v60  ;;  %v1649_v53 = vld [vmem:[%s3163_s10] sm:$0xff]  ;;  %1665 = vperm.xlu1 %2118, %v1651_v47   ;;  %v1650_v60 = vld [vmem:[%s3163_s10 + $0x8] sm:$0xff] }
 0x328   :  { %2453 = vtanh.f32 %v2066_v14  ;;  %v2068_v56 = vadd.f32 %v1308_v50, %v3064_v27  ;;  %1573 = vmatmul.mubr.bf16.gmra.mrb[56].mxu0 %v1377_v61  ;;  %1655 = vperm.xlu0 %2117, %v1649_v53   ;;  %v1652_v14 = vld [vmem:[%s3163_s10 + $0x18] sm:$0xff]  ;;  %v1738_v15 = vld [vmem:[%s3164_s11] sm:$0xff]  ;;  %v1740_v50 = vld [vmem:[%s3164_s11 + $0x10] sm:$0xff] }
 0x329   :  { %v2444_v0 = vpop.eup %2443  ;;  %2455 = vtanh.f32 %v2067_v62  ;;  %v1739_v62 = vld [vmem:[%s3164_s11 + $0x8] sm:$0xff] }
 0x32a   :  { %v2446_v17 = vpop.eup %2445  ;;  %2457 = vtanh.f32 %v2068_v56  ;;  %v1741_v56 = vld [vmem:[%s3164_s11 + $0x18] sm:$0xff] }
 0x32b   :  { %v2448_v19 = vpop.eup %2447  ;;  %1670 = vperm.xlu1 %2118, %v1652_v14  }
 0x32c   :  { %v2450_v32 = vpop.eup %2449  ;;  %v1312_v42 = vpop.f32.mrb[52].mxu1  ;;  %v1379_v55 = vpack.c.bf16 %v2448_v19, %v2444_v0  ;;  %1660 = vperm.xlu0 %2117, %v1650_v60   ;;  %v1775_v0 = vld [vmem:[#allocation2] sm:$0x1] }
 0x32d   :  { %v2069_v58 = vadd.f32 %v1312_v42, %v3060_v26  ;;  %v1314_v2 = vpop.f32.mrb[53].mxu1  ;;  %v1380_v3 = vpack.c.bf16 %v2450_v32, %v2446_v17  ;;  %v3128_v19 = vld [vmem:[%s3161_s8] ss:$0 sm:$0xff] }
 0x32e   :  { %v2070_v9 = vadd.f32 %v1314_v2, %v3064_v27  ;;  %v1316_v28 = vpop.f32.mrb[54].mxu1 }
 0x32f   :  { %2459 = vtanh.f32 %v2069_v58  ;;  %v2071_v40 = vadd.f32 %v1316_v28, %v3060_v26  ;;  %v1318_v7 = vpop.f32.mrb[55].mxu1  ;;  %1580 = vmatprep.mubr.bf16.mxu0 %v1380_v3  ;;  %1749 = vperm.xlu1 %2118, %v1739_v62  }
 0x330   :  { %2461 = vtanh.f32 %v2070_v9  ;;  %v2072_v11 = vadd.f32 %v1318_v7, %v3064_v27  ;;  %1581 = vmatmul.mubr.bf16.gmra.mrb[60].mxu0 %v1379_v55  ;;  %1744 = vperm.xlu0 %2117, %v1738_v15  }
 0x331   :  { %v2452_v41 = vpop.eup %2451  ;;  %2463 = vtanh.f32 %v2071_v40 }
 0x332   :  { %v2454_v51 = vpop.eup %2453  ;;  %2465 = vtanh.f32 %v2072_v11 }
 0x333   :  { %v2456_v52 = vpop.eup %2455  ;;  %1759 = vperm.xlu1 %2118, %v1741_v56  }
 0x334   :  { %v2458_v57 = vpop.eup %2457  ;;  %v1322_v6 = vpop.f32.mrb[56].mxu1  ;;  %v1381_v29 = vpack.c.bf16 %v2456_v52, %v2452_v41  ;;  %1754 = vperm.xlu0 %2117, %v1740_v50  }
 0x335   :  { %v2073_v30 = vadd.f32 %v1322_v6, %v3060_v26  ;;  %v1324_v38 = vpop.f32.mrb[57].mxu1  ;;  %v1382_v39 = vpack.c.bf16 %v2458_v57, %v2454_v51 }
 0x336   :  { %v2074_v46 = vadd.f32 %v1324_v38, %v3064_v27  ;;  %v1326_v63 = vpop.f32.mrb[58].mxu1 }
 0x337   :  { %2467 = vtanh.f32 %v2073_v30  ;;  %v2075_v22 = vadd.f32 %v1326_v63, %v3060_v26  ;;  %v1328_v23 = vpop.f32.mrb[59].mxu1  ;;  %1588 = vmatprep.mubr.bf16.mxu0 %v1382_v39 }
 0x338   :  { %2469 = vtanh.f32 %v2074_v46  ;;  %v2076_v36 = vadd.f32 %v1328_v23, %v3064_v27  ;;  %1589 = vmatmul.mubr.bf16.gmra.mrb[64].mxu0 %v1381_v29  ;;  %1778 = vperm.xlu0 %2117, %v1775_v0  }
 0x339   :  { %v2460_v37 = vpop.eup %2459  ;;  %2471 = vtanh.f32 %v2075_v22 }
 0x33a   :  { %v2462_v45 = vpop.eup %2461  ;;  %2473 = vtanh.f32 %v2076_v36 }
 0x33b   :  { %v2464_v43 = vpop.eup %2463 }
 0x33c   :  { %v2466_v31 = vpop.eup %2465  ;;  %v1332_v34 = vpop.f32.mrb[60].mxu1  ;;  %v1383_v13 = vpack.c.bf16 %v2464_v43, %v2460_v37 }
 0x33d   :  { %v2077_v1 = vadd.f32 %v1332_v34, %v3060_v26  ;;  %v1334_v4 = vpop.f32.mrb[61].mxu1  ;;  %v1384_v5 = vpack.c.bf16 %v2466_v31, %v2462_v45 }
 0x33e   :  { %v2078_v10 = vadd.f32 %v1334_v4, %v3064_v27  ;;  %v1336_v16 = vpop.f32.mrb[62].mxu1 }
 0x33f   :  { %2475 = vtanh.f32 %v2077_v1  ;;  %v2079_v12 = vadd.f32 %v1336_v16, %v3060_v26  ;;  %v1338_v20 = vpop.f32.mrb[63].mxu1  ;;  %1596 = vmatprep.mubr.bf16.mxu0 %v1384_v5 }
 0x340   :  { %2477 = vtanh.f32 %v2078_v10  ;;  %v2080_v18 = vadd.f32 %v1338_v20, %v3064_v27  ;;  %1597 = vmatmul.mubr.bf16.gmra.mrb[68].mxu0 %v1383_v13  ;;  %v2257_v27 = vld [vmem:[%s3162_s9] sm:$0xff]  }
 0x341   :  { %v2468_v21 = vpop.eup %2467  ;;  %2479 = vtanh.f32 %v2079_v12 }
 0x342   :  { %v2470_v24 = vpop.eup %2469  ;;  %2481 = vtanh.f32 %v2080_v18 }
 0x343   :  { %v2472_v25 = vpop.eup %2471 }
 0x344   :  { %v2474_v35 = vpop.eup %2473  ;;  %v1385_v44 = vpack.c.bf16 %v2472_v25, %v2468_v21 }
 0x345   :  { %v1386_v48 = vpack.c.bf16 %v2474_v35, %v2470_v24 }
 0x347   :  { %1604 = vmatprep.mubr.bf16.mxu0 %v1386_v48 }
 0x348   :  { %1605 = vmatmul.mubr.bf16.gmra.mrb[72].mxu0 %v1385_v44 }
 0x349   :  { %v2476_v49 = vpop.eup %2475 }
 0x34a   :  { %v2478_v33 = vpop.eup %2477 }
 0x34b   :  { %v2480_v54 = vpop.eup %2479 }
 0x34c   :  { %v2482_v26 = vpop.eup %2481  ;;  %v1387_v59 = vpack.c.bf16 %v2480_v54, %v2476_v49 }
 0x34d   :  { %v1388_v61 = vpack.c.bf16 %v2482_v26, %v2478_v33 }
 0x34f   :  { %1612 = vmatprep.mubr.bf16.mxu0 %v1388_v61 }
 0x350   :  { %1613 = vmatmul.mubr.bf16.gmra.mrb[76].mxu0 %v1387_v59 }
 0x351   :  { %2045 = vmatprep.mubr.bf16.mxu0 %v2257_v27 }
 0x3eb   :  { %v1951_v17 = vpop.f32.mrb[48].mxu0 }
 0x3ec   :  { %v1952_v32 = vpop.f32.mrb[49].mxu0 }
 0x3ed   :  { %v1953_v42 = vadd.f32 %v1952_v32, %v1951_v17  ;;  %v1954_v55 = vpop.f32.mrb[50].mxu0 }
 0x3ee   :  { %v1955_v58 = vpop.f32.mrb[51].mxu0 }
 0x3ef   :  { %v1559_v2 = vadd.f32 %v1953_v42, %v3128_v19  ;;  %v1956_v3 = vadd.f32 %v1955_v58, %v1954_v55 }
 0x3f1   :  { %v1562_v9 = vadd.f32 %v1956_v3, %v3128_v19  ;;  %2483 = vtanh.f32 %v1559_v2 }
 0x3f3   :  { %2485 = vtanh.f32 %v1562_v9  ;;  %v1957_v28 = vpop.f32.mrb[52].mxu0 }
 0x3f4   :  { %v1958_v40 = vpop.f32.mrb[53].mxu0 }
 0x3f5   :  { %v1959_v7 = vadd.f32 %v1958_v40, %v1957_v28  ;;  %v1960_v11 = vpop.f32.mrb[54].mxu0 }
 0x3f6   :  { %v1961_v41 = vpop.f32.mrb[55].mxu0 }
 0x3f7   :  { %v1567_v51 = vadd.f32 %v1959_v7, %v3128_v19  ;;  %v1962_v52 = vadd.f32 %v1961_v41, %v1960_v11 }
 0x3f9   :  { %v1570_v57 = vadd.f32 %v1962_v52, %v3128_v19  ;;  %2487 = vtanh.f32 %v1567_v51 }
 0x3fb   :  { %2489 = vtanh.f32 %v1570_v57  ;;  %v1963_v6 = vpop.f32.mrb[56].mxu0  ;;  %v2484_v29 = vpop.eup %2483 }
 0x3fc   :  { %v1964_v30 = vpop.f32.mrb[57].mxu0 }
 0x3fd   :  { %v2486_v38 = vpop.eup %2485  ;;  %v1965_v39 = vadd.f32 %v1964_v30, %v1963_v6  ;;  %v1966_v46 = vpop.f32.mrb[58].mxu0 }
 0x3fe   :  { %v1967_v63 = vpop.f32.mrb[59].mxu0  ;;  %v1637_v22 = vpack.c.bf16 %v2486_v38, %v2484_v29 }
 0x3ff   :  { %v1575_v23 = vadd.f32 %v1965_v39, %v3128_v19  ;;  %v1968_v36 = vadd.f32 %v1967_v63, %v1966_v46 }
 0x400   :  { %2029 = vmatprep.subr.bf16.mxu0 %v1637_v22 }
 0x401   :  { %v1578_v37 = vadd.f32 %v1968_v36, %v3128_v19  ;;  %2030 = vmatpush3.bf16.xpose.msra.mxu0 %v1637_v22  ;;  %2491 = vtanh.f32 %v1575_v23 }
 0x403   :  { %2493 = vtanh.f32 %v1578_v37  ;;  %v1969_v45 = vpop.f32.mrb[60].mxu0  ;;  %v2488_v43 = vpop.eup %2487  ;;  %v2258_v37 = vld [vmem:[%s3162_s9 + $0x8] sm:$0xff]  }
 0x404   :  { %v1970_v31 = vpop.f32.mrb[61].mxu0 }
 0x405   :  { %v2490_v34 = vpop.eup %2489  ;;  %v1971_v13 = vadd.f32 %v1970_v31, %v1969_v45  ;;  %v1972_v1 = vpop.f32.mrb[62].mxu0 }
 0x406   :  { %v1973_v4 = vpop.f32.mrb[63].mxu0  ;;  %v1638_v5 = vpack.c.bf16 %v2490_v34, %v2488_v43  ;;  %v1656_v45 = vpop.permute.xlu0 %1655 }
 0x407   :  { %v1583_v10 = vadd.f32 %v1971_v13, %v3128_v19  ;;  %v1974_v16 = vadd.f32 %v1973_v4, %v1972_v1 }
 0x408   :  { %2031 = vmatprep.subr.bf16.mxu0 %v1638_v5 }
 0x409   :  { %v1586_v12 = vadd.f32 %v1974_v16, %v3128_v19  ;;  %2032 = vmatpush3.bf16.xpose.msra.mxu0 %v1638_v5  ;;  %2495 = vtanh.f32 %v1583_v10 }
 0x40a   :  { %v1661_v13 = vpop.permute.xlu0 %1660 }
 0x40b   :  { %2497 = vtanh.f32 %v1586_v12  ;;  %v1975_v20 = vpop.f32.mrb[64].mxu0  ;;  %v2492_v18 = vpop.eup %2491 }
 0x40c   :  { %v1976_v21 = vpop.f32.mrb[65].mxu0 }
 0x40d   :  { %v2494_v24 = vpop.eup %2493  ;;  %v1977_v25 = vadd.f32 %v1976_v21, %v1975_v20  ;;  %v1978_v35 = vpop.f32.mrb[66].mxu0 }
 0x40e   :  { %v1979_v44 = vpop.f32.mrb[67].mxu0  ;;  %v1639_v48 = vpack.c.bf16 %v2494_v24, %v2492_v18  ;;  %v1745_v20 = vpop.permute.xlu0 %1744 }
 0x40f   :  { %v1591_v49 = vadd.f32 %v1977_v25, %v3128_v19  ;;  %v1980_v33 = vadd.f32 %v1979_v44, %v1978_v35 }
 0x410   :  { %2033 = vmatprep.subr.bf16.mxu0 %v1639_v48 }
 0x411   :  { %v1594_v54 = vadd.f32 %v1980_v33, %v3128_v19  ;;  %2034 = vmatpush3.bf16.xpose.msra.mxu0 %v1639_v48  ;;  %2499 = vtanh.f32 %v1591_v49 }
 0x412   :  { %v1755_v49 = vpop.permute.xlu0 %1754 }
 0x413   :  { %2501 = vtanh.f32 %v1594_v54  ;;  %v1981_v26 = vpop.f32.mrb[68].mxu0  ;;  %v2496_v59 = vpop.eup %2495 }
 0x414   :  { %v1982_v61 = vpop.f32.mrb[69].mxu0 }
 0x415   :  { %v2498_v27 = vpop.eup %2497  ;;  %v1983_v53 = vadd.f32 %v1982_v61, %v1981_v26  ;;  %v1984_v47 = vpop.f32.mrb[70].mxu0 }
 0x416   :  { %v1985_v60 = vpop.f32.mrb[71].mxu0  ;;  %v1640_v14 = vpack.c.bf16 %v2498_v27, %v2496_v59 }
 0x417   :  { %v1599_v15 = vadd.f32 %v1983_v53, %v3128_v19  ;;  %v1986_v62 = vadd.f32 %v1985_v60, %v1984_v47 }
 0x418   :  { %2035 = vmatprep.subr.bf16.mxu0 %v1640_v14 }
 0x419   :  { %v1602_v50 = vadd.f32 %v1986_v62, %v3128_v19  ;;  %2036 = vmatpush3.bf16.xpose.msra.mxu0 %v1640_v14  ;;  %2503 = vtanh.f32 %v1599_v15  ;;  %v1779_v15 = vpop.permute.xlu0 %1778 }
 0x41b   :  { %2505 = vtanh.f32 %v1602_v50  ;;  %v1987_v56 = vpop.f32.mrb[72].mxu0  ;;  %v2500_v0 = vpop.eup %2499  ;;  %v1784_v50 = vrot.slane %v1779_v15, %v2808_v8 }
 0x41c   :  { %v1988_v17 = vpop.f32.mrb[73].mxu0 }
 0x41d   :  { %v2502_v32 = vpop.eup %2501  ;;  %v1989_v42 = vadd.f32 %v1988_v17, %v1987_v56  ;;  %v1990_v55 = vpop.f32.mrb[74].mxu0 }
 0x41e   :  { %v1991_v58 = vpop.f32.mrb[75].mxu0  ;;  %v1641_v2 = vpack.c.bf16 %v2502_v32, %v2500_v0 }
 0x41f   :  { %v1607_v3 = vadd.f32 %v1989_v42, %v3128_v19  ;;  %v1992_v9 = vadd.f32 %v1991_v58, %v1990_v55 }
 0x420   :  { %2037 = vmatprep.subr.bf16.mxu0 %v1641_v2 }
 0x421   :  { %v1610_v28 = vadd.f32 %v1992_v9, %v3128_v19  ;;  %2038 = vmatpush3.bf16.xpose.msra.mxu0 %v1641_v2  ;;  %2507 = vtanh.f32 %v1607_v3 }
 0x423   :  { %2509 = vtanh.f32 %v1610_v28  ;;  %v1993_v40 = vpop.f32.mrb[76].mxu0  ;;  %v2504_v7 = vpop.eup %2503 }
 0x424   :  { %v1994_v11 = vpop.f32.mrb[77].mxu0 }
 0x425   :  { %v2506_v41 = vpop.eup %2505  ;;  %v1995_v51 = vadd.f32 %v1994_v11, %v1993_v40  ;;  %v1996_v52 = vpop.f32.mrb[78].mxu0 }
 0x426   :  { %v1997_v57 = vpop.f32.mrb[79].mxu0  ;;  %v1642_v6 = vpack.c.bf16 %v2506_v41, %v2504_v7 }
 0x427   :  { %v1615_v29 = vadd.f32 %v1995_v51, %v3128_v19  ;;  %v1998_v30 = vadd.f32 %v1997_v57, %v1996_v52 }
 0x428   :  { %2039 = vmatprep.subr.bf16.mxu0 %v1642_v6 }
 0x429   :  { %v1618_v38 = vadd.f32 %v1998_v30, %v3128_v19  ;;  %2040 = vmatpush3.bf16.xpose.msra.mxu0 %v1642_v6  ;;  %2511 = vtanh.f32 %v1615_v29  ;;  %v1666_v19 = vpop.permute.xlu1 %1665 }
 0x42b   :  { %2513 = vtanh.f32 %v1618_v38  ;;  %v2508_v39 = vpop.eup %2507 }
 0x42d   :  { %v2510_v46 = vpop.eup %2509  ;;  %v1671_v5 = vpop.permute.xlu1 %1670 }
 0x42e   :  { %v1643_v63 = vpack.c.bf16 %v2510_v46, %v2508_v39 }
 0x430   :  { %2041 = vmatprep.subr.bf16.mxu0 %v1643_v63 }
 0x431   :  { %2042 = vmatpush3.bf16.xpose.msra.mxu0 %v1643_v63  ;;  %v1750_v21 = vpop.permute.xlu1 %1749 }
 0x433   :  { %v2512_v22 = vpop.eup %2511 }
 0x435   :  { %v2514_v23 = vpop.eup %2513  ;;  %v1760_v26 = vpop.permute.xlu1 %1759 }
 0x436   :  { %v1644_v36 = vpack.c.bf16 %v2514_v23, %v2512_v22 }
 0x438   :  { %2043 = vmatprep.subr.bf16.mxu0 %v1644_v36 }
 0x439   :  { %2044 = vmatpush3.bf16.xpose.msra.mxu0 %v1644_v36 }
 0x440   :  { %2046 = vmatmul.mubr.bf16.vlgmr.msra.gmra.mrb[80].mxu0 %v2258_v37 }
 0x513   :  { %v2047_v43 = vpop.f32.mrb[80].mxu0 }
 0x514   :  { %v1728_v31 = vadd.f32 %v2047_v43, %v1666_v19  ;;  %v1719_v34 = vpop.f32.mrb[81].mxu0 }
 0x515   :  { %v1720_v1 = vadd.f32 %v1719_v34, %v1656_v45  ;;  %v2048_v4 = vpop.f32.mrb[82].mxu0 }
 0x516   :  { %v1722_v10 = vpop.f32.mrb[83].mxu0  ;;  %v1731_v16 = vadd.f32 %v2048_v4, %v1671_v5 }
 0x517   :  { %2515 = vtanh.f32 %v1720_v1  ;;  %v1723_v12 = vadd.f32 %v1722_v10, %v1661_v13 }
 0x518   :  { %2517 = vtanh.f32 %v1728_v31 }
 0x519   :  { %2519 = vtanh.f32 %v1723_v12 }
 0x51a   :  { %2521 = vtanh.f32 %v1731_v16 }
 0x521   :  { %v2516_v18 = vpop.eup %2515 }
 0x522   :  { %v2518_v24 = vpop.eup %2517  ;;  %v1762_v35 = vmul.f32 %v2516_v18, %v1745_v20 }
 0x523   :  { %v2520_v25 = vpop.eup %2519  ;;  %v1764_v33 = vmul.f32 %v2518_v24, %v1755_v49 }
 0x524   :  { %v1763_v44 = vmul.f32 %v2520_v25, %v1750_v21  ;;  %v2522_v48 = vpop.eup %2521 }
 0x525   :  { %v1765_v59 = vmul.f32 %v2522_v48, %v1760_v26 }
 0x526   :  { %v1766_v54 = vadd.f32 %v1763_v44, %v1762_v35 }
 0x528   :  { %v1767_v61 = vadd.f32 %v1766_v54, %v1764_v33 }
 0x52a   :  { %v1768_v27 = vadd.f32 %v1767_v61, %v1765_v59 }
 0x52c   :  { %v1769_v53 = vrot.slane %v1768_v27, 4 }
 0x52e   :  { %v1770_v47 = vadd.f32 %v1769_v53, %v1768_v27 }
 0x530   :  { %v1771_v60 = vrot.slane %v1770_v47, 2 }
 0x532   :  { %v1772_v14 = vadd.f32 %v1771_v60, %v1770_v47 }
 0x534   :  { %v1773_v62 = vrot.slane %v1772_v14, 1 }
 0x536   :  { %v1774_v56 = vadd.f32 %v1773_v62, %v1772_v14 }
 0x538   :  { %v1785_v0 = vadd.f32 %v1784_v50, %v1774_v56 }
 0x53a   :  { %v1924_v17 = vmul.f32 -1.442695, %v1785_v0 }
 0x53c   :  { %2523 = vpow2.f32 %v1924_v17 }
 0x546   :  { %v2524_v32 = vpop.eup %2523 }
 0x547   :  { %v1789_v42 = vadd.f32 1.0, %v2524_v32 }
 0x549   :  { %2525 = vrcp.f32 %v1789_v42 }
 0x553   :  { %v2526_v55 = vpop.eup %2525 }
 0x554   :  { %1792 = vst [vmem:[%s3166_s13] sm:$0x1] %v2526_v55 }
 0x555   :  { %1797 = vsyncpa [#allocation4], 1 }

</bundles_post_ra>
